<compile_context>
chip_gen: v7x
topology: tpu7x:2x2x1
jax: 0.10.0
libtpu: 0.0.40
codegen_flags: <defaults>
</compile_context>

<pallas_src>
import jax
import jax.numpy as jnp
from jax.experimental import pallas as pl
from jax.experimental.pallas import tpu as pltpu

H_FEAT = 128          # GRU hidden size / conv channels (fixed by the module)
KS = (1, 2, 3)        # Conv1d kernel widths


# ----------------------------------------------------------------------------
# Fused kernel: GRU recurrence + Conv1d(1,2,3)+ReLU+maxpool + Linear + sigmoid
# ----------------------------------------------------------------------------
def sentcnn_kernel(gi_ref, whh_ref, bhn_ref,
                   w1_ref, b1_ref, w2_ref, b2_ref, w3_ref, b3_ref,
                   fcw_ref, fcb_ref, out_ref):
    """Per-batch-tile fused forward.

    gi_ref : (T, TB, L, 3h) f32   precomputed x_t @ W_ih^T + b_ih (+b_hh r,z)
    whh_ref: (h, 3h)        bf16  W_hh^T
    bhn_ref: (1, h)         f32   b_hh of the n gate (r,z parts folded into gi)
    wK_ref : (K*h, h)       bf16  conv weights, taps stacked along the K axis
    bK_ref : (1, h)         f32   conv biases
    fcw_ref: (1, 3h) f32, fcb_ref: (1, 1) f32
    out_ref: (TB, 1)        f32
    """
    h = H_FEAT
    T, TB, L, _ = gi_ref.shape

    w_hh = whh_ref[...]                      # (h, 3h) bf16, VMEM resident
    b_hn = bhn_ref[...]                      # (1, h)  f32

    # ---- GRU recurrence (PyTorch gate order r, z, n; h0 = 0) ----------------
    def step(t, h_prev):
        gi = gi_ref[t]                       # (TB, L, 3h) f32 (input proj. + biases)
        gh = jax.lax.dot_general(            # only recurrent matmul on the critical path
            h_prev.astype(jnp.bfloat16), w_hh,
            dimension_numbers=(((2,), (0,)), ((), ())),
            preferred_element_type=jnp.float32)           # (TB, L, 3h) f32
        # Single sigmoid over the contiguous r|z slab (biases pre-folded in gi).
        rz = jax.nn.sigmoid(gi[..., :2 * h] + gh[..., :2 * h])
        r = rz[..., :h]
        z = rz[..., h:]
        n = jnp.tanh(gi[..., 2 * h:] + r * (gh[..., 2 * h:] + b_hn))
        return (1.0 - z) * n + z * h_prev

    h0 = jnp.zeros((TB, L, h), jnp.float32)
    H = jax.lax.fori_loop(0, T, step, h0, unroll=True)    # (TB, L, h) final hidden

    # ---- Conv1d(K) + ReLU + global max-pool, channels-last ------------------
    # out[b, t, o] = bias[o] + sum_{k,i} H[b, t+k, i] * W[k, i, o]
    # Taps fused into one contraction of depth K*128 per kernel size.
    # TODO(synk): the k=1,2 sublane-offset slices may relayout; at production
    # doc_len prefer pltpu.roll-based shifting (XLU slot is idle here).
    Hbf = H.astype(jnp.bfloat16)
    pooled = []
    for w_ref, b_ref, ksz in ((w1_ref, b1_ref, 1),
                              (w2_ref, b2_ref, 2),
                              (w3_ref, b3_ref, 3)):
        lout = L - ksz + 1
        if ksz == 1:
            x_cat = Hbf
        else:
            x_cat = jnp.concatenate(
                [Hbf[:, k:k + lout, :] for k in range(ksz)], axis=-1)  # (TB,lout,ksz*h)
        acc = jax.lax.dot_general(
            x_cat, w_ref[...],
            dimension_numbers=(((2,), (0,)), ((), ())),
            preferred_element_type=jnp.float32) + b_ref[...]           # (TB,lout,h)
        y = jnp.maximum(acc, 0.0)                                      # ReLU (dropout p=0 = identity)
        pooled.append(jnp.max(y, axis=1))                              # global max-pool -> (TB, h)
    feat = jnp.concatenate(pooled, axis=-1)                            # (TB, 3h)

    # ---- Linear(384 -> 1) as a lane reduce (avoid an N=1 MXU matmul) --------
    logit = jnp.sum(feat * fcw_ref[...], axis=-1, keepdims=True) + fcb_ref[...]
    out_ref[...] = jax.nn.sigmoid(logit)                               # (TB, 1)


def _pick_batch_tile(batch):
    """Prefer an 8-aligned tile that divides the batch (enables a multi-tile
    'parallel' grid for v7x's two TensorCores); else take the whole batch."""
    for tb in (256, 128, 64, 32, 16, 8):
        if batch % tb == 0:
            return tb
    return batch


def sentcnn_fused(gi, w_hh_bf, b_hh_n, conv_w_cat, conv_b, fc_w_row, fc_b):
    T, B, L, G = gi.shape
    h = H_FEAT
    tb = _pick_batch_tile(B)
    grid = (B // tb,)

    def rep(shape):
        # Full-array block, replicated across the batch grid axis.
        return pl.BlockSpec(shape, lambda b: (0,) * len(shape))

    return pl.pallas_call(
        sentcnn_kernel,
        out_shape=jax.ShapeDtypeStruct((B, 1), jnp.float32),
        grid_spec=pltpu.PrefetchScalarGridSpec(
            num_scalar_prefetch=0,
            grid=grid,
            in_specs=[
                pl.BlockSpec((T, tb, L, G), lambda b: (0, b, 0, 0)),  # GI
                rep((h, 3 * h)),                                      # W_hh^T (bf16)
                rep((1, h)),                                          # b_hh (n gate)
                rep((1 * h, h)), rep((1, h)),                         # conv K=1
                rep((2 * h, h)), rep((1, h)),                         # conv K=2
                rep((3 * h, h)), rep((1, h)),                         # conv K=3
                rep((1, 3 * h)), rep((1, 1)),                         # fc
            ],
            out_specs=pl.BlockSpec((tb, 1), lambda b: (b, 0)),
        ),
        compiler_params=pltpu.CompilerParams(
            dimension_semantics=("parallel",)),
    )(gi, w_hh_bf, b_hh_n,
      conv_w_cat[0], conv_b[0], conv_w_cat[1], conv_b[1],
      conv_w_cat[2], conv_b[2], fc_w_row, fc_b)


# ----------------------------------------------------------------------------
# Full forward. Plain-JAX glue: fold W_ih into the embedding table and gather.
# ----------------------------------------------------------------------------
@jax.jit
def sentcnn_forward(x_tokens, params):
    h = H_FEAT
    # emb_proj[w] = Emb[w] @ W_ih^T + b_ih + [b_hh_r, b_hh_z, 0]
    # -> the GRU's per-timestep input matmul becomes a pure gather.
    rz_fold = jnp.concatenate(
        [params["b_hh"][:, :2 * h], jnp.zeros((1, h), jnp.float32)], axis=1)
    emb_proj = (jnp.dot(params["embedding"], params["w_ih_t"],
                        preferred_element_type=jnp.float32)
                + params["b_ih"] + rz_fold)                   # (n_words, 3h)

    # Time-major gather: (T, B, L, 3h). Transposing the small int token array
    # is cheaper than transposing the gathered f32 tensor.
    gi = emb_proj[jnp.transpose(x_tokens, (2, 0, 1))]

    b_hh_n = params["b_hh"][:, 2 * h:]                        # (1, h)
    w_hh_bf = params["w_hh_t"].astype(jnp.bfloat16)           # (h, 3h)
    # Conv weights (K, I, O) -> (K*I, O): rows k*I + i match the lane-concat of
    # shifted H slices inside the kernel. bf16 for the MXU, f32 accumulation.
    conv_w_cat = [w.reshape(-1, h).astype(jnp.bfloat16) for w in params["conv_w"]]
    fc_w_row = params["fc_w"].T                               # (1, 3h)

    return sentcnn_fused(gi, w_hh_bf, b_hh_n, conv_w_cat, params["conv_b"],
                         fc_w_row, params["fc_b"])            # (B, 1), sigmoid'ed


def init_params(key, n_words, emb_dim):
    h = H_FEAT
    ks = jax.random.split(key, 13)
    scale = 0.1
    return {
        "embedding": scale * jax.random.normal(ks[0], (n_words, emb_dim), jnp.float32),
        # GRU weights, gate order r,z,n stacked along the 3h axis (transposed for x @ W)
        "w_ih_t": scale * jax.random.normal(ks[1], (emb_dim, 3 * h), jnp.float32),
        "w_hh_t": scale * jax.random.normal(ks[2], (h, 3 * h), jnp.float32),
        "b_ih": scale * jax.random.normal(ks[3], (1, 3 * h), jnp.float32),
        "b_hh": scale * jax.random.normal(ks[4], (1, 3 * h), jnp.float32),
        # Conv1d weights stored as (K, in, out); biases (1, out)
        "conv_w": [scale * jax.random.normal(ks[5 + i], (K, h, h), jnp.float32)
                   for i, K in enumerate(KS)],
        "conv_b": [scale * jax.random.normal(ks[8 + i], (1, h), jnp.float32)
                   for i in range(len(KS))],
        # Linear(3*128 -> 1)
        "fc_w": scale * jax.random.normal(ks[11], (len(KS) * h, 1), jnp.float32),
        "fc_b": scale * jax.random.normal(ks[12], (1, 1), jnp.float32),
    }


if __name__ == "__main__":
    # Small shapes consistent with the module (doc_len >= 3 for the K=3 conv).
    batch, doc_len, sent_len = 2, 4, 8
    n_words, emb_dim = 50, 32

    key = jax.random.PRNGKey(0)
    k_par, k_tok = jax.random.split(key)
    params = init_params(k_par, n_words, emb_dim)
    x_tokens = jax.random.randint(k_tok, (batch, doc_len, sent_len), 0, n_words,
                                  dtype=jnp.int32)

    out = jax.block_until_ready(sentcnn_forward(x_tokens, params))

    assert out.shape == (batch, 1), out.shape
    assert bool(jnp.all(jnp.isfinite(out)))
    assert bool(jnp.all((out > 0.0) & (out < 1.0)))   # sigmoid output range
    print("KERNEL_OK")
</pallas_src>

<mosaic_0001>
module attributes {stable_mosaic.version = 11 : i64} {
  func.func @sentcnn_kernel(%arg0: i32, %arg1: memref<8x2x4x384xf32, #tpu.memory_space<vmem>>, %arg2: memref<128x384xbf16, #tpu.memory_space<vmem>>, %arg3: memref<1x128xf32, #tpu.memory_space<vmem>>, %arg4: memref<128x128xbf16, #tpu.memory_space<vmem>>, %arg5: memref<1x128xf32, #tpu.memory_space<vmem>>, %arg6: memref<256x128xbf16, #tpu.memory_space<vmem>>, %arg7: memref<1x128xf32, #tpu.memory_space<vmem>>, %arg8: memref<384x128xbf16, #tpu.memory_space<vmem>>, %arg9: memref<1x128xf32, #tpu.memory_space<vmem>>, %arg10: memref<1x384xf32, #tpu.memory_space<vmem>>, %arg11: memref<1x1xf32, #tpu.memory_space<vmem>>, %arg12: memref<2x1xf32, #tpu.memory_space<vmem>>) attributes {dimension_semantics = [#tpu.dimension_semantics<parallel>], iteration_bounds = array<i64: 1>, scalar_prefetch = 0 : i64, scratch_operands = 0 : i64, tpu.core_type = #tpu.core_type<tc>, window_params = [{transform_indices = @transform_0, window_bounds = array<i64: 8, 2, 4, 384>}, {pipeline_mode = #tpu.pipeline_mode<synchronous>, transform_indices = @transform_1, window_bounds = array<i64: 128, 384>}, {pipeline_mode = #tpu.pipeline_mode<synchronous>, transform_indices = @transform_2, window_bounds = array<i64: 1, 128>}, {pipeline_mode = #tpu.pipeline_mode<synchronous>, transform_indices = @transform_3, window_bounds = array<i64: 128, 128>}, {pipeline_mode = #tpu.pipeline_mode<synchronous>, transform_indices = @transform_4, window_bounds = array<i64: 1, 128>}, {pipeline_mode = #tpu.pipeline_mode<synchronous>, transform_indices = @transform_5, window_bounds = array<i64: 256, 128>}, {pipeline_mode = #tpu.pipeline_mode<synchronous>, transform_indices = @transform_6, window_bounds = array<i64: 1, 128>}, {pipeline_mode = #tpu.pipeline_mode<synchronous>, transform_indices = @transform_7, window_bounds = array<i64: 384, 128>}, {pipeline_mode = #tpu.pipeline_mode<synchronous>, transform_indices = @transform_8, window_bounds = array<i64: 1, 128>}, {pipeline_mode = #tpu.pipeline_mode<synchronous>, transform_indices = @transform_9, window_bounds = array<i64: 1, 384>}, {pipeline_mode = #tpu.pipeline_mode<synchronous>, transform_indices = @transform_10, window_bounds = array<i64: 1, 1>}, {transform_indices = @transform_11, window_bounds = array<i64: 2, 1>}]} {
    %c0 = arith.constant 0 : index
    %c0_0 = arith.constant 0 : index
    %0 = vector.load %arg2[%c0, %c0_0] : memref<128x384xbf16, #tpu.memory_space<vmem>>, vector<128x384xbf16>
    %c0_1 = arith.constant 0 : index
    %c0_2 = arith.constant 0 : index
    %1 = vector.load %arg3[%c0_1, %c0_2] : memref<1x128xf32, #tpu.memory_space<vmem>>, vector<1x128xf32>
    %cst = arith.constant 0.000000e+00 : f32
    %2 = vector.broadcast %cst : f32 to vector<2x4x128xf32>
    %c0_i32 = arith.constant 0 : i32
    %3 = arith.index_cast %c0_i32 : i32 to index
    %c0_3 = arith.constant 0 : index
    %c0_4 = arith.constant 0 : index
    %c0_5 = arith.constant 0 : index
    %4 = vector.load %arg1[%3, %c0_3, %c0_4, %c0_5] : memref<8x2x4x384xf32, #tpu.memory_space<vmem>>, vector<1x2x4x384xf32>
    %5 = vector.shape_cast %4 : vector<1x2x4x384xf32> to vector<2x4x384xf32>
    %6 = arith.truncf %2 : vector<2x4x128xf32> to vector<2x4x128xbf16>
    %cst_6 = arith.constant dense<0.000000e+00> : vector<2x4x384xf32>
    %7 = tpu.matmul %6, %0, %cst_6 {dimension_numbers = #tpu.dot_dimension_numbers<[2], [0], [0, 1], [1], [0, 0, 0, 1, 1, 1], [], []>} : vector<2x4x128xbf16>, vector<128x384xbf16>, vector<2x4x384xf32> -> vector<2x4x384xf32>
    %8 = vector.extract_strided_slice %5 {offsets = [0, 0, 0], sizes = [2, 4, 256], strides = [1, 1, 1]} : vector<2x4x384xf32> to vector<2x4x256xf32>
    %9 = vector.extract_strided_slice %7 {offsets = [0, 0, 0], sizes = [2, 4, 256], strides = [1, 1, 1]} : vector<2x4x384xf32> to vector<2x4x256xf32>
    %10 = arith.addf %8, %9 : vector<2x4x256xf32>
    %11 = arith.negf %10 : vector<2x4x256xf32>
    %12 = math.exp %11 : vector<2x4x256xf32>
    %cst_7 = arith.constant 1.000000e+00 : f32
    %13 = vector.broadcast %cst_7 : f32 to vector<2x4x256xf32>
    %14 = arith.addf %13, %12 : vector<2x4x256xf32>
    %15 = arith.divf %13, %14 : vector<2x4x256xf32>
    %16 = vector.extract_strided_slice %15 {offsets = [0, 0, 0], sizes = [2, 4, 128], strides = [1, 1, 1]} : vector<2x4x256xf32> to vector<2x4x128xf32>
    %17 = vector.extract_strided_slice %15 {offsets = [0, 0, 128], sizes = [2, 4, 128], strides = [1, 1, 1]} : vector<2x4x256xf32> to vector<2x4x128xf32>
    %18 = vector.extract_strided_slice %5 {offsets = [0, 0, 256], sizes = [2, 4, 128], strides = [1, 1, 1]} : vector<2x4x384xf32> to vector<2x4x128xf32>
    %19 = vector.extract_strided_slice %7 {offsets = [0, 0, 256], sizes = [2, 4, 128], strides = [1, 1, 1]} : vector<2x4x384xf32> to vector<2x4x128xf32>
    %20 = vector.shape_cast %1 : vector<1x128xf32> to vector<1x1x128xf32>
    %21 = vector.broadcast %20 : vector<1x1x128xf32> to vector<2x4x128xf32>
    %22 = arith.addf %19, %21 : vector<2x4x128xf32>
    %23 = arith.mulf %16, %22 : vector<2x4x128xf32>
    %24 = arith.addf %18, %23 : vector<2x4x128xf32>
    %25 = math.tanh %24 : vector<2x4x128xf32>
    %cst_8 = arith.constant 1.000000e+00 : f32
    %26 = vector.broadcast %cst_8 : f32 to vector<2x4x128xf32>
    %27 = arith.subf %26, %17 : vector<2x4x128xf32>
    %28 = arith.mulf %27, %25 : vector<2x4x128xf32>
    %29 = arith.mulf %17, %2 : vector<2x4x128xf32>
    %30 = arith.addf %28, %29 : vector<2x4x128xf32>
    %c1_i32 = arith.constant 1 : i32
    %31 = arith.index_cast %c1_i32 : i32 to index
    %c0_9 = arith.constant 0 : index
    %c0_10 = arith.constant 0 : index
    %c0_11 = arith.constant 0 : index
    %32 = vector.load %arg1[%31, %c0_9, %c0_10, %c0_11] : memref<8x2x4x384xf32, #tpu.memory_space<vmem>>, vector<1x2x4x384xf32>
    %33 = vector.shape_cast %32 : vector<1x2x4x384xf32> to vector<2x4x384xf32>
    %34 = arith.truncf %30 : vector<2x4x128xf32> to vector<2x4x128xbf16>
    %cst_12 = arith.constant dense<0.000000e+00> : vector<2x4x384xf32>
    %35 = tpu.matmul %34, %0, %cst_12 {dimension_numbers = #tpu.dot_dimension_numbers<[2], [0], [0, 1], [1], [0, 0, 0, 1, 1, 1], [], []>} : vector<2x4x128xbf16>, vector<128x384xbf16>, vector<2x4x384xf32> -> vector<2x4x384xf32>
    %36 = vector.extract_strided_slice %33 {offsets = [0, 0, 0], sizes = [2, 4, 256], strides = [1, 1, 1]} : vector<2x4x384xf32> to vector<2x4x256xf32>
    %37 = vector.extract_strided_slice %35 {offsets = [0, 0, 0], sizes = [2, 4, 256], strides = [1, 1, 1]} : vector<2x4x384xf32> to vector<2x4x256xf32>
    %38 = arith.addf %36, %37 : vector<2x4x256xf32>
    %39 = arith.negf %38 : vector<2x4x256xf32>
    %40 = math.exp %39 : vector<2x4x256xf32>
    %cst_13 = arith.constant 1.000000e+00 : f32
    %41 = vector.broadcast %cst_13 : f32 to vector<2x4x256xf32>
    %42 = arith.addf %41, %40 : vector<2x4x256xf32>
    %43 = arith.divf %41, %42 : vector<2x4x256xf32>
    %44 = vector.extract_strided_slice %43 {offsets = [0, 0, 0], sizes = [2, 4, 128], strides = [1, 1, 1]} : vector<2x4x256xf32> to vector<2x4x128xf32>
    %45 = vector.extract_strided_slice %43 {offsets = [0, 0, 128], sizes = [2, 4, 128], strides = [1, 1, 1]} : vector<2x4x256xf32> to vector<2x4x128xf32>
    %46 = vector.extract_strided_slice %33 {offsets = [0, 0, 256], sizes = [2, 4, 128], strides = [1, 1, 1]} : vector<2x4x384xf32> to vector<2x4x128xf32>
    %47 = vector.extract_strided_slice %35 {offsets = [0, 0, 256], sizes = [2, 4, 128], strides = [1, 1, 1]} : vector<2x4x384xf32> to vector<2x4x128xf32>
    %48 = vector.shape_cast %1 : vector<1x128xf32> to vector<1x1x128xf32>
    %49 = vector.broadcast %48 : vector<1x1x128xf32> to vector<2x4x128xf32>
    %50 = arith.addf %47, %49 : vector<2x4x128xf32>
    %51 = arith.mulf %44, %50 : vector<2x4x128xf32>
    %52 = arith.addf %46, %51 : vector<2x4x128xf32>
    %53 = math.tanh %52 : vector<2x4x128xf32>
    %cst_14 = arith.constant 1.000000e+00 : f32
    %54 = vector.broadcast %cst_14 : f32 to vector<2x4x128xf32>
    %55 = arith.subf %54, %45 : vector<2x4x128xf32>
    %56 = arith.mulf %55, %53 : vector<2x4x128xf32>
    %57 = arith.mulf %45, %30 : vector<2x4x128xf32>
    %58 = arith.addf %56, %57 : vector<2x4x128xf32>
    %c2_i32 = arith.constant 2 : i32
    %59 = arith.index_cast %c2_i32 : i32 to index
    %c0_15 = arith.constant 0 : index
    %c0_16 = arith.constant 0 : index
    %c0_17 = arith.constant 0 : index
    %60 = vector.load %arg1[%59, %c0_15, %c0_16, %c0_17] : memref<8x2x4x384xf32, #tpu.memory_space<vmem>>, vector<1x2x4x384xf32>
    %61 = vector.shape_cast %60 : vector<1x2x4x384xf32> to vector<2x4x384xf32>
    %62 = arith.truncf %58 : vector<2x4x128xf32> to vector<2x4x128xbf16>
    %cst_18 = arith.constant dense<0.000000e+00> : vector<2x4x384xf32>
    %63 = tpu.matmul %62, %0, %cst_18 {dimension_numbers = #tpu.dot_dimension_numbers<[2], [0], [0, 1], [1], [0, 0, 0, 1, 1, 1], [], []>} : vector<2x4x128xbf16>, vector<128x384xbf16>, vector<2x4x384xf32> -> vector<2x4x384xf32>
    %64 = vector.extract_strided_slice %61 {offsets = [0, 0, 0], sizes = [2, 4, 256], strides = [1, 1, 1]} : vector<2x4x384xf32> to vector<2x4x256xf32>
    %65 = vector.extract_strided_slice %63 {offsets = [0, 0, 0], sizes = [2, 4, 256], strides = [1, 1, 1]} : vector<2x4x384xf32> to vector<2x4x256xf32>
    %66 = arith.addf %64, %65 : vector<2x4x256xf32>
    %67 = arith.negf %66 : vector<2x4x256xf32>
    %68 = math.exp %67 : vector<2x4x256xf32>
    %cst_19 = arith.constant 1.000000e+00 : f32
    %69 = vector.broadcast %cst_19 : f32 to vector<2x4x256xf32>
    %70 = arith.addf %69, %68 : vector<2x4x256xf32>
    %71 = arith.divf %69, %70 : vector<2x4x256xf32>
    %72 = vector.extract_strided_slice %71 {offsets = [0, 0, 0], sizes = [2, 4, 128], strides = [1, 1, 1]} : vector<2x4x256xf32> to vector<2x4x128xf32>
    %73 = vector.extract_strided_slice %71 {offsets = [0, 0, 128], sizes = [2, 4, 128], strides = [1, 1, 1]} : vector<2x4x256xf32> to vector<2x4x128xf32>
    %74 = vector.extract_strided_slice %61 {offsets = [0, 0, 256], sizes = [2, 4, 128], strides = [1, 1, 1]} : vector<2x4x384xf32> to vector<2x4x128xf32>
    %75 = vector.extract_strided_slice %63 {offsets = [0, 0, 256], sizes = [2, 4, 128], strides = [1, 1, 1]} : vector<2x4x384xf32> to vector<2x4x128xf32>
    %76 = vector.shape_cast %1 : vector<1x128xf32> to vector<1x1x128xf32>
    %77 = vector.broadcast %76 : vector<1x1x128xf32> to vector<2x4x128xf32>
    %78 = arith.addf %75, %77 : vector<2x4x128xf32>
    %79 = arith.mulf %72, %78 : vector<2x4x128xf32>
    %80 = arith.addf %74, %79 : vector<2x4x128xf32>
    %81 = math.tanh %80 : vector<2x4x128xf32>
    %cst_20 = arith.constant 1.000000e+00 : f32
    %82 = vector.broadcast %cst_20 : f32 to vector<2x4x128xf32>
    %83 = arith.subf %82, %73 : vector<2x4x128xf32>
    %84 = arith.mulf %83, %81 : vector<2x4x128xf32>
    %85 = arith.mulf %73, %58 : vector<2x4x128xf32>
    %86 = arith.addf %84, %85 : vector<2x4x128xf32>
    %c3_i32 = arith.constant 3 : i32
    %87 = arith.index_cast %c3_i32 : i32 to index
    %c0_21 = arith.constant 0 : index
    %c0_22 = arith.constant 0 : index
    %c0_23 = arith.constant 0 : index
    %88 = vector.load %arg1[%87, %c0_21, %c0_22, %c0_23] : memref<8x2x4x384xf32, #tpu.memory_space<vmem>>, vector<1x2x4x384xf32>
    %89 = vector.shape_cast %88 : vector<1x2x4x384xf32> to vector<2x4x384xf32>
    %90 = arith.truncf %86 : vector<2x4x128xf32> to vector<2x4x128xbf16>
    %cst_24 = arith.constant dense<0.000000e+00> : vector<2x4x384xf32>
    %91 = tpu.matmul %90, %0, %cst_24 {dimension_numbers = #tpu.dot_dimension_numbers<[2], [0], [0, 1], [1], [0, 0, 0, 1, 1, 1], [], []>} : vector<2x4x128xbf16>, vector<128x384xbf16>, vector<2x4x384xf32> -> vector<2x4x384xf32>
    %92 = vector.extract_strided_slice %89 {offsets = [0, 0, 0], sizes = [2, 4, 256], strides = [1, 1, 1]} : vector<2x4x384xf32> to vector<2x4x256xf32>
    %93 = vector.extract_strided_slice %91 {offsets = [0, 0, 0], sizes = [2, 4, 256], strides = [1, 1, 1]} : vector<2x4x384xf32> to vector<2x4x256xf32>
    %94 = arith.addf %92, %93 : vector<2x4x256xf32>
    %95 = arith.negf %94 : vector<2x4x256xf32>
    %96 = math.exp %95 : vector<2x4x256xf32>
    %cst_25 = arith.constant 1.000000e+00 : f32
    %97 = vector.broadcast %cst_25 : f32 to vector<2x4x256xf32>
    %98 = arith.addf %97, %96 : vector<2x4x256xf32>
    %99 = arith.divf %97, %98 : vector<2x4x256xf32>
    %100 = vector.extract_strided_slice %99 {offsets = [0, 0, 0], sizes = [2, 4, 128], strides = [1, 1, 1]} : vector<2x4x256xf32> to vector<2x4x128xf32>
    %101 = vector.extract_strided_slice %99 {offsets = [0, 0, 128], sizes = [2, 4, 128], strides = [1, 1, 1]} : vector<2x4x256xf32> to vector<2x4x128xf32>
    %102 = vector.extract_strided_slice %89 {offsets = [0, 0, 256], sizes = [2, 4, 128], strides = [1, 1, 1]} : vector<2x4x384xf32> to vector<2x4x128xf32>
    %103 = vector.extract_strided_slice %91 {offsets = [0, 0, 256], sizes = [2, 4, 128], strides = [1, 1, 1]} : vector<2x4x384xf32> to vector<2x4x128xf32>
    %104 = vector.shape_cast %1 : vector<1x128xf32> to vector<1x1x128xf32>
    %105 = vector.broadcast %104 : vector<1x1x128xf32> to vector<2x4x128xf32>
    %106 = arith.addf %103, %105 : vector<2x4x128xf32>
    %107 = arith.mulf %100, %106 : vector<2x4x128xf32>
    %108 = arith.addf %102, %107 : vector<2x4x128xf32>
    %109 = math.tanh %108 : vector<2x4x128xf32>
    %cst_26 = arith.constant 1.000000e+00 : f32
    %110 = vector.broadcast %cst_26 : f32 to vector<2x4x128xf32>
    %111 = arith.subf %110, %101 : vector<2x4x128xf32>
    %112 = arith.mulf %111, %109 : vector<2x4x128xf32>
    %113 = arith.mulf %101, %86 : vector<2x4x128xf32>
    %114 = arith.addf %112, %113 : vector<2x4x128xf32>
    %c4_i32 = arith.constant 4 : i32
    %115 = arith.index_cast %c4_i32 : i32 to index
    %c0_27 = arith.constant 0 : index
    %c0_28 = arith.constant 0 : index
    %c0_29 = arith.constant 0 : index
    %116 = vector.load %arg1[%115, %c0_27, %c0_28, %c0_29] : memref<8x2x4x384xf32, #tpu.memory_space<vmem>>, vector<1x2x4x384xf32>
    %117 = vector.shape_cast %116 : vector<1x2x4x384xf32> to vector<2x4x384xf32>
    %118 = arith.truncf %114 : vector<2x4x128xf32> to vector<2x4x128xbf16>
    %cst_30 = arith.constant dense<0.000000e+00> : vector<2x4x384xf32>
    %119 = tpu.matmul %118, %0, %cst_30 {dimension_numbers = #tpu.dot_dimension_numbers<[2], [0], [0, 1], [1], [0, 0, 0, 1, 1, 1], [], []>} : vector<2x4x128xbf16>, vector<128x384xbf16>, vector<2x4x384xf32> -> vector<2x4x384xf32>
    %120 = vector.extract_strided_slice %117 {offsets = [0, 0, 0], sizes = [2, 4, 256], strides = [1, 1, 1]} : vector<2x4x384xf32> to vector<2x4x256xf32>
    %121 = vector.extract_strided_slice %119 {offsets = [0, 0, 0], sizes = [2, 4, 256], strides = [1, 1, 1]} : vector<2x4x384xf32> to vector<2x4x256xf32>
    %122 = arith.addf %120, %121 : vector<2x4x256xf32>
    %123 = arith.negf %122 : vector<2x4x256xf32>
    %124 = math.exp %123 : vector<2x4x256xf32>
    %cst_31 = arith.constant 1.000000e+00 : f32
    %125 = vector.broadcast %cst_31 : f32 to vector<2x4x256xf32>
    %126 = arith.addf %125, %124 : vector<2x4x256xf32>
    %127 = arith.divf %125, %126 : vector<2x4x256xf32>
    %128 = vector.extract_strided_slice %127 {offsets = [0, 0, 0], sizes = [2, 4, 128], strides = [1, 1, 1]} : vector<2x4x256xf32> to vector<2x4x128xf32>
    %129 = vector.extract_strided_slice %127 {offsets = [0, 0, 128], sizes = [2, 4, 128], strides = [1, 1, 1]} : vector<2x4x256xf32> to vector<2x4x128xf32>
    %130 = vector.extract_strided_slice %117 {offsets = [0, 0, 256], sizes = [2, 4, 128], strides = [1, 1, 1]} : vector<2x4x384xf32> to vector<2x4x128xf32>
    %131 = vector.extract_strided_slice %119 {offsets = [0, 0, 256], sizes = [2, 4, 128], strides = [1, 1, 1]} : vector<2x4x384xf32> to vector<2x4x128xf32>
    %132 = vector.shape_cast %1 : vector<1x128xf32> to vector<1x1x128xf32>
    %133 = vector.broadcast %132 : vector<1x1x128xf32> to vector<2x4x128xf32>
    %134 = arith.addf %131, %133 : vector<2x4x128xf32>
    %135 = arith.mulf %128, %134 : vector<2x4x128xf32>
    %136 = arith.addf %130, %135 : vector<2x4x128xf32>
    %137 = math.tanh %136 : vector<2x4x128xf32>
    %cst_32 = arith.constant 1.000000e+00 : f32
    %138 = vector.broadcast %cst_32 : f32 to vector<2x4x128xf32>
    %139 = arith.subf %138, %129 : vector<2x4x128xf32>
    %140 = arith.mulf %139, %137 : vector<2x4x128xf32>
    %141 = arith.mulf %129, %114 : vector<2x4x128xf32>
    %142 = arith.addf %140, %141 : vector<2x4x128xf32>
    %c5_i32 = arith.constant 5 : i32
    %143 = arith.index_cast %c5_i32 : i32 to index
    %c0_33 = arith.constant 0 : index
    %c0_34 = arith.constant 0 : index
    %c0_35 = arith.constant 0 : index
    %144 = vector.load %arg1[%143, %c0_33, %c0_34, %c0_35] : memref<8x2x4x384xf32, #tpu.memory_space<vmem>>, vector<1x2x4x384xf32>
    %145 = vector.shape_cast %144 : vector<1x2x4x384xf32> to vector<2x4x384xf32>
    %146 = arith.truncf %142 : vector<2x4x128xf32> to vector<2x4x128xbf16>
    %cst_36 = arith.constant dense<0.000000e+00> : vector<2x4x384xf32>
    %147 = tpu.matmul %146, %0, %cst_36 {dimension_numbers = #tpu.dot_dimension_numbers<[2], [0], [0, 1], [1], [0, 0, 0, 1, 1, 1], [], []>} : vector<2x4x128xbf16>, vector<128x384xbf16>, vector<2x4x384xf32> -> vector<2x4x384xf32>
    %148 = vector.extract_strided_slice %145 {offsets = [0, 0, 0], sizes = [2, 4, 256], strides = [1, 1, 1]} : vector<2x4x384xf32> to vector<2x4x256xf32>
    %149 = vector.extract_strided_slice %147 {offsets = [0, 0, 0], sizes = [2, 4, 256], strides = [1, 1, 1]} : vector<2x4x384xf32> to vector<2x4x256xf32>
    %150 = arith.addf %148, %149 : vector<2x4x256xf32>
    %151 = arith.negf %150 : vector<2x4x256xf32>
    %152 = math.exp %151 : vector<2x4x256xf32>
    %cst_37 = arith.constant 1.000000e+00 : f32
    %153 = vector.broadcast %cst_37 : f32 to vector<2x4x256xf32>
    %154 = arith.addf %153, %152 : vector<2x4x256xf32>
    %155 = arith.divf %153, %154 : vector<2x4x256xf32>
    %156 = vector.extract_strided_slice %155 {offsets = [0, 0, 0], sizes = [2, 4, 128], strides = [1, 1, 1]} : vector<2x4x256xf32> to vector<2x4x128xf32>
    %157 = vector.extract_strided_slice %155 {offsets = [0, 0, 128], sizes = [2, 4, 128], strides = [1, 1, 1]} : vector<2x4x256xf32> to vector<2x4x128xf32>
    %158 = vector.extract_strided_slice %145 {offsets = [0, 0, 256], sizes = [2, 4, 128], strides = [1, 1, 1]} : vector<2x4x384xf32> to vector<2x4x128xf32>
    %159 = vector.extract_strided_slice %147 {offsets = [0, 0, 256], sizes = [2, 4, 128], strides = [1, 1, 1]} : vector<2x4x384xf32> to vector<2x4x128xf32>
    %160 = vector.shape_cast %1 : vector<1x128xf32> to vector<1x1x128xf32>
    %161 = vector.broadcast %160 : vector<1x1x128xf32> to vector<2x4x128xf32>
    %162 = arith.addf %159, %161 : vector<2x4x128xf32>
    %163 = arith.mulf %156, %162 : vector<2x4x128xf32>
    %164 = arith.addf %158, %163 : vector<2x4x128xf32>
    %165 = math.tanh %164 : vector<2x4x128xf32>
    %cst_38 = arith.constant 1.000000e+00 : f32
    %166 = vector.broadcast %cst_38 : f32 to vector<2x4x128xf32>
    %167 = arith.subf %166, %157 : vector<2x4x128xf32>
    %168 = arith.mulf %167, %165 : vector<2x4x128xf32>
    %169 = arith.mulf %157, %142 : vector<2x4x128xf32>
    %170 = arith.addf %168, %169 : vector<2x4x128xf32>
    %c6_i32 = arith.constant 6 : i32
    %171 = arith.index_cast %c6_i32 : i32 to index
    %c0_39 = arith.constant 0 : index
    %c0_40 = arith.constant 0 : index
    %c0_41 = arith.constant 0 : index
    %172 = vector.load %arg1[%171, %c0_39, %c0_40, %c0_41] : memref<8x2x4x384xf32, #tpu.memory_space<vmem>>, vector<1x2x4x384xf32>
    %173 = vector.shape_cast %172 : vector<1x2x4x384xf32> to vector<2x4x384xf32>
    %174 = arith.truncf %170 : vector<2x4x128xf32> to vector<2x4x128xbf16>
    %cst_42 = arith.constant dense<0.000000e+00> : vector<2x4x384xf32>
    %175 = tpu.matmul %174, %0, %cst_42 {dimension_numbers = #tpu.dot_dimension_numbers<[2], [0], [0, 1], [1], [0, 0, 0, 1, 1, 1], [], []>} : vector<2x4x128xbf16>, vector<128x384xbf16>, vector<2x4x384xf32> -> vector<2x4x384xf32>
    %176 = vector.extract_strided_slice %173 {offsets = [0, 0, 0], sizes = [2, 4, 256], strides = [1, 1, 1]} : vector<2x4x384xf32> to vector<2x4x256xf32>
    %177 = vector.extract_strided_slice %175 {offsets = [0, 0, 0], sizes = [2, 4, 256], strides = [1, 1, 1]} : vector<2x4x384xf32> to vector<2x4x256xf32>
    %178 = arith.addf %176, %177 : vector<2x4x256xf32>
    %179 = arith.negf %178 : vector<2x4x256xf32>
    %180 = math.exp %179 : vector<2x4x256xf32>
    %cst_43 = arith.constant 1.000000e+00 : f32
    %181 = vector.broadcast %cst_43 : f32 to vector<2x4x256xf32>
    %182 = arith.addf %181, %180 : vector<2x4x256xf32>
    %183 = arith.divf %181, %182 : vector<2x4x256xf32>
    %184 = vector.extract_strided_slice %183 {offsets = [0, 0, 0], sizes = [2, 4, 128], strides = [1, 1, 1]} : vector<2x4x256xf32> to vector<2x4x128xf32>
    %185 = vector.extract_strided_slice %183 {offsets = [0, 0, 128], sizes = [2, 4, 128], strides = [1, 1, 1]} : vector<2x4x256xf32> to vector<2x4x128xf32>
    %186 = vector.extract_strided_slice %173 {offsets = [0, 0, 256], sizes = [2, 4, 128], strides = [1, 1, 1]} : vector<2x4x384xf32> to vector<2x4x128xf32>
    %187 = vector.extract_strided_slice %175 {offsets = [0, 0, 256], sizes = [2, 4, 128], strides = [1, 1, 1]} : vector<2x4x384xf32> to vector<2x4x128xf32>
    %188 = vector.shape_cast %1 : vector<1x128xf32> to vector<1x1x128xf32>
    %189 = vector.broadcast %188 : vector<1x1x128xf32> to vector<2x4x128xf32>
    %190 = arith.addf %187, %189 : vector<2x4x128xf32>
    %191 = arith.mulf %184, %190 : vector<2x4x128xf32>
    %192 = arith.addf %186, %191 : vector<2x4x128xf32>
    %193 = math.tanh %192 : vector<2x4x128xf32>
    %cst_44 = arith.constant 1.000000e+00 : f32
    %194 = vector.broadcast %cst_44 : f32 to vector<2x4x128xf32>
    %195 = arith.subf %194, %185 : vector<2x4x128xf32>
    %196 = arith.mulf %195, %193 : vector<2x4x128xf32>
    %197 = arith.mulf %185, %170 : vector<2x4x128xf32>
    %198 = arith.addf %196, %197 : vector<2x4x128xf32>
    %c7_i32 = arith.constant 7 : i32
    %199 = arith.index_cast %c7_i32 : i32 to index
    %c0_45 = arith.constant 0 : index
    %c0_46 = arith.constant 0 : index
    %c0_47 = arith.constant 0 : index
    %200 = vector.load %arg1[%199, %c0_45, %c0_46, %c0_47] : memref<8x2x4x384xf32, #tpu.memory_space<vmem>>, vector<1x2x4x384xf32>
    %201 = vector.shape_cast %200 : vector<1x2x4x384xf32> to vector<2x4x384xf32>
    %202 = arith.truncf %198 : vector<2x4x128xf32> to vector<2x4x128xbf16>
    %cst_48 = arith.constant dense<0.000000e+00> : vector<2x4x384xf32>
    %203 = tpu.matmul %202, %0, %cst_48 {dimension_numbers = #tpu.dot_dimension_numbers<[2], [0], [0, 1], [1], [0, 0, 0, 1, 1, 1], [], []>} : vector<2x4x128xbf16>, vector<128x384xbf16>, vector<2x4x384xf32> -> vector<2x4x384xf32>
    %204 = vector.extract_strided_slice %201 {offsets = [0, 0, 0], sizes = [2, 4, 256], strides = [1, 1, 1]} : vector<2x4x384xf32> to vector<2x4x256xf32>
    %205 = vector.extract_strided_slice %203 {offsets = [0, 0, 0], sizes = [2, 4, 256], strides = [1, 1, 1]} : vector<2x4x384xf32> to vector<2x4x256xf32>
    %206 = arith.addf %204, %205 : vector<2x4x256xf32>
    %207 = arith.negf %206 : vector<2x4x256xf32>
    %208 = math.exp %207 : vector<2x4x256xf32>
    %cst_49 = arith.constant 1.000000e+00 : f32
    %209 = vector.broadcast %cst_49 : f32 to vector<2x4x256xf32>
    %210 = arith.addf %209, %208 : vector<2x4x256xf32>
    %211 = arith.divf %209, %210 : vector<2x4x256xf32>
    %212 = vector.extract_strided_slice %211 {offsets = [0, 0, 0], sizes = [2, 4, 128], strides = [1, 1, 1]} : vector<2x4x256xf32> to vector<2x4x128xf32>
    %213 = vector.extract_strided_slice %211 {offsets = [0, 0, 128], sizes = [2, 4, 128], strides = [1, 1, 1]} : vector<2x4x256xf32> to vector<2x4x128xf32>
    %214 = vector.extract_strided_slice %201 {offsets = [0, 0, 256], sizes = [2, 4, 128], strides = [1, 1, 1]} : vector<2x4x384xf32> to vector<2x4x128xf32>
    %215 = vector.extract_strided_slice %203 {offsets = [0, 0, 256], sizes = [2, 4, 128], strides = [1, 1, 1]} : vector<2x4x384xf32> to vector<2x4x128xf32>
    %216 = vector.shape_cast %1 : vector<1x128xf32> to vector<1x1x128xf32>
    %217 = vector.broadcast %216 : vector<1x1x128xf32> to vector<2x4x128xf32>
    %218 = arith.addf %215, %217 : vector<2x4x128xf32>
    %219 = arith.mulf %212, %218 : vector<2x4x128xf32>
    %220 = arith.addf %214, %219 : vector<2x4x128xf32>
    %221 = math.tanh %220 : vector<2x4x128xf32>
    %cst_50 = arith.constant 1.000000e+00 : f32
    %222 = vector.broadcast %cst_50 : f32 to vector<2x4x128xf32>
    %223 = arith.subf %222, %213 : vector<2x4x128xf32>
    %224 = arith.mulf %223, %221 : vector<2x4x128xf32>
    %225 = arith.mulf %213, %198 : vector<2x4x128xf32>
    %226 = arith.addf %224, %225 : vector<2x4x128xf32>
    %c8_i32 = arith.constant 8 : i32
    %227 = arith.truncf %226 : vector<2x4x128xf32> to vector<2x4x128xbf16>
    %c0_51 = arith.constant 0 : index
    %c0_52 = arith.constant 0 : index
    %228 = vector.load %arg4[%c0_51, %c0_52] : memref<128x128xbf16, #tpu.memory_space<vmem>>, vector<128x128xbf16>
    %cst_53 = arith.constant dense<0.000000e+00> : vector<2x4x128xf32>
    %229 = tpu.matmul %227, %228, %cst_53 {dimension_numbers = #tpu.dot_dimension_numbers<[2], [0], [0, 1], [1], [0, 0, 0, 1, 1, 1], [], []>} : vector<2x4x128xbf16>, vector<128x128xbf16>, vector<2x4x128xf32> -> vector<2x4x128xf32>
    %c0_54 = arith.constant 0 : index
    %c0_55 = arith.constant 0 : index
    %230 = vector.load %arg5[%c0_54, %c0_55] : memref<1x128xf32, #tpu.memory_space<vmem>>, vector<1x128xf32>
    %231 = vector.shape_cast %230 : vector<1x128xf32> to vector<1x1x128xf32>
    %232 = vector.broadcast %231 : vector<1x1x128xf32> to vector<2x4x128xf32>
    %233 = arith.addf %229, %232 : vector<2x4x128xf32>
    %cst_56 = arith.constant 0.000000e+00 : f32
    %234 = vector.broadcast %cst_56 : f32 to vector<2x4x128xf32>
    %235 = arith.maximumf %233, %234 : vector<2x4x128xf32>
    %cst_57 = arith.constant dense<0xFF800000> : vector<2x128xf32>
    %236 = vector.multi_reduction <maximumf>, %235, %cst_57 [1] : vector<2x4x128xf32> to vector<2x128xf32>
    %237 = vector.extract_strided_slice %227 {offsets = [0, 0, 0], sizes = [2, 3, 128], strides = [1, 1, 1]} : vector<2x4x128xbf16> to vector<2x3x128xbf16>
    %238 = vector.extract_strided_slice %227 {offsets = [0, 1, 0], sizes = [2, 3, 128], strides = [1, 1, 1]} : vector<2x4x128xbf16> to vector<2x3x128xbf16>
    %239 = tpu.concatenate %237, %238 in 2 : vector<2x3x128xbf16>, vector<2x3x128xbf16> -> vector<2x3x256xbf16>
    %c0_58 = arith.constant 0 : index
    %c0_59 = arith.constant 0 : index
    %240 = vector.load %arg6[%c0_58, %c0_59] : memref<256x128xbf16, #tpu.memory_space<vmem>>, vector<256x128xbf16>
    %cst_60 = arith.constant dense<0.000000e+00> : vector<2x3x128xf32>
    %241 = tpu.matmul %239, %240, %cst_60 {dimension_numbers = #tpu.dot_dimension_numbers<[2], [0], [0, 1], [1], [0, 0, 0, 1, 1, 1], [], []>} : vector<2x3x256xbf16>, vector<256x128xbf16>, vector<2x3x128xf32> -> vector<2x3x128xf32>
    %c0_61 = arith.constant 0 : index
    %c0_62 = arith.constant 0 : index
    %242 = vector.load %arg7[%c0_61, %c0_62] : memref<1x128xf32, #tpu.memory_space<vmem>>, vector<1x128xf32>
    %243 = vector.shape_cast %242 : vector<1x128xf32> to vector<1x1x128xf32>
    %244 = vector.broadcast %243 : vector<1x1x128xf32> to vector<2x3x128xf32>
    %245 = arith.addf %241, %244 : vector<2x3x128xf32>
    %cst_63 = arith.constant 0.000000e+00 : f32
    %246 = vector.broadcast %cst_63 : f32 to vector<2x3x128xf32>
    %247 = arith.maximumf %245, %246 : vector<2x3x128xf32>
    %cst_64 = arith.constant dense<0xFF800000> : vector<2x128xf32>
    %248 = vector.multi_reduction <maximumf>, %247, %cst_64 [1] : vector<2x3x128xf32> to vector<2x128xf32>
    %249 = vector.extract_strided_slice %227 {offsets = [0, 0, 0], sizes = [2, 2, 128], strides = [1, 1, 1]} : vector<2x4x128xbf16> to vector<2x2x128xbf16>
    %250 = vector.extract_strided_slice %227 {offsets = [0, 1, 0], sizes = [2, 2, 128], strides = [1, 1, 1]} : vector<2x4x128xbf16> to vector<2x2x128xbf16>
    %251 = vector.extract_strided_slice %227 {offsets = [0, 2, 0], sizes = [2, 2, 128], strides = [1, 1, 1]} : vector<2x4x128xbf16> to vector<2x2x128xbf16>
    %252 = tpu.concatenate %249, %250, %251 in 2 : vector<2x2x128xbf16>, vector<2x2x128xbf16>, vector<2x2x128xbf16> -> vector<2x2x384xbf16>
    %c0_65 = arith.constant 0 : index
    %c0_66 = arith.constant 0 : index
    %253 = vector.load %arg8[%c0_65, %c0_66] : memref<384x128xbf16, #tpu.memory_space<vmem>>, vector<384x128xbf16>
    %cst_67 = arith.constant dense<0.000000e+00> : vector<2x2x128xf32>
    %254 = tpu.matmul %252, %253, %cst_67 {dimension_numbers = #tpu.dot_dimension_numbers<[2], [0], [0, 1], [1], [0, 0, 0, 1, 1, 1], [], []>} : vector<2x2x384xbf16>, vector<384x128xbf16>, vector<2x2x128xf32> -> vector<2x2x128xf32>
    %c0_68 = arith.constant 0 : index
    %c0_69 = arith.constant 0 : index
    %255 = vector.load %arg9[%c0_68, %c0_69] : memref<1x128xf32, #tpu.memory_space<vmem>>, vector<1x128xf32>
    %256 = vector.shape_cast %255 : vector<1x128xf32> to vector<1x1x128xf32>
    %257 = vector.broadcast %256 : vector<1x1x128xf32> to vector<2x2x128xf32>
    %258 = arith.addf %254, %257 : vector<2x2x128xf32>
    %cst_70 = arith.constant 0.000000e+00 : f32
    %259 = vector.broadcast %cst_70 : f32 to vector<2x2x128xf32>
    %260 = arith.maximumf %258, %259 : vector<2x2x128xf32>
    %cst_71 = arith.constant dense<0xFF800000> : vector<2x128xf32>
    %261 = vector.multi_reduction <maximumf>, %260, %cst_71 [1] : vector<2x2x128xf32> to vector<2x128xf32>
    %262 = tpu.concatenate %236, %248, %261 in 1 : vector<2x128xf32>, vector<2x128xf32>, vector<2x128xf32> -> vector<2x384xf32>
    %c0_72 = arith.constant 0 : index
    %c0_73 = arith.constant 0 : index
    %263 = vector.load %arg10[%c0_72, %c0_73] : memref<1x384xf32, #tpu.memory_space<vmem>>, vector<1x384xf32>
    %264 = vector.broadcast %263 : vector<1x384xf32> to vector<2x384xf32>
    %265 = arith.mulf %262, %264 : vector<2x384xf32>
    %cst_74 = arith.constant dense<0.000000e+00> : vector<2xf32>
    %266 = vector.multi_reduction <add>, %265, %cst_74 [1] : vector<2x384xf32> to vector<2xf32>
    %267 = vector.shape_cast %266 : vector<2xf32> to vector<2x1xf32>
    %c0_75 = arith.constant 0 : index
    %c0_76 = arith.constant 0 : index
    %268 = vector.load %arg11[%c0_75, %c0_76] : memref<1x1xf32, #tpu.memory_space<vmem>>, vector<1x1xf32>
    %269 = vector.broadcast %268 : vector<1x1xf32> to vector<2x1xf32>
    %270 = arith.addf %267, %269 : vector<2x1xf32>
    %271 = arith.negf %270 : vector<2x1xf32>
    %272 = math.exp %271 : vector<2x1xf32>
    %cst_77 = arith.constant 1.000000e+00 : f32
    %273 = vector.broadcast %cst_77 : f32 to vector<2x1xf32>
    %274 = arith.addf %273, %272 : vector<2x1xf32>
    %275 = arith.divf %273, %274 : vector<2x1xf32>
    %c0_78 = arith.constant 0 : index
    %c0_79 = arith.constant 0 : index
    %276 = vector.load %arg12[%c0_78, %c0_79] : memref<2x1xf32, #tpu.memory_space<vmem>>, vector<2x1xf32>
    tpu.vector_store %arg12[%c0_78, %c0_79], %275 {strides = array<i32>} : memref<2x1xf32, #tpu.memory_space<vmem>>, vector<2x1xf32>,
    return
  }
  func.func @transform_0(%arg0: i32) -> (i32, i32, i32, i32) {
    %c0_i32 = arith.constant 0 : i32
    %c0_i32_0 = arith.constant 0 : i32
    %c0_i32_1 = arith.constant 0 : i32
    %c0_i32_2 = arith.constant 0 : i32
    return %c0_i32, %arg0, %c0_i32_0, %c0_i32_1 : i32, i32, i32, i32
  }
  func.func @transform_1(%arg0: i32) -> (i32, i32) {
    %c0_i32 = arith.constant 0 : i32
    %c0_i32_0 = arith.constant 0 : i32
    %c0_i32_1 = arith.constant 0 : i32
    return %c0_i32, %c0_i32_0 : i32, i32
  }
  func.func @transform_2(%arg0: i32) -> (i32, i32) {
    %c0_i32 = arith.constant 0 : i32
    %c0_i32_0 = arith.constant 0 : i32
    %c0_i32_1 = arith.constant 0 : i32
    return %c0_i32, %c0_i32_0 : i32, i32
  }
  func.func @transform_3(%arg0: i32) -> (i32, i32) {
    %c0_i32 = arith.constant 0 : i32
    %c0_i32_0 = arith.constant 0 : i32
    %c0_i32_1 = arith.constant 0 : i32
    return %c0_i32, %c0_i32_0 : i32, i32
  }
  func.func @transform_4(%arg0: i32) -> (i32, i32) {
    %c0_i32 = arith.constant 0 : i32
    %c0_i32_0 = arith.constant 0 : i32
    %c0_i32_1 = arith.constant 0 : i32
    return %c0_i32, %c0_i32_0 : i32, i32
  }
  func.func @transform_5(%arg0: i32) -> (i32, i32) {
    %c0_i32 = arith.constant 0 : i32
    %c0_i32_0 = arith.constant 0 : i32
    %c0_i32_1 = arith.constant 0 : i32
    return %c0_i32, %c0_i32_0 : i32, i32
  }
  func.func @transform_6(%arg0: i32) -> (i32, i32) {
    %c0_i32 = arith.constant 0 : i32
    %c0_i32_0 = arith.constant 0 : i32
    %c0_i32_1 = arith.constant 0 : i32
    return %c0_i32, %c0_i32_0 : i32, i32
  }
  func.func @transform_7(%arg0: i32) -> (i32, i32) {
    %c0_i32 = arith.constant 0 : i32
    %c0_i32_0 = arith.constant 0 : i32
    %c0_i32_1 = arith.constant 0 : i32
    return %c0_i32, %c0_i32_0 : i32, i32
  }
  func.func @transform_8(%arg0: i32) -> (i32, i32) {
    %c0_i32 = arith.constant 0 : i32
    %c0_i32_0 = arith.constant 0 : i32
    %c0_i32_1 = arith.constant 0 : i32
    return %c0_i32, %c0_i32_0 : i32, i32
  }
  func.func @transform_9(%arg0: i32) -> (i32, i32) {
    %c0_i32 = arith.constant 0 : i32
    %c0_i32_0 = arith.constant 0 : i32
    %c0_i32_1 = arith.constant 0 : i32
    return %c0_i32, %c0_i32_0 : i32, i32
  }
  func.func @transform_10(%arg0: i32) -> (i32, i32) {
    %c0_i32 = arith.constant 0 : i32
    %c0_i32_0 = arith.constant 0 : i32
    %c0_i32_1 = arith.constant 0 : i32
    return %c0_i32, %c0_i32_0 : i32, i32
  }
  func.func @transform_11(%arg0: i32) -> (i32, i32) {
    %c0_i32 = arith.constant 0 : i32
    %c0_i32_0 = arith.constant 0 : i32
    return %arg0, %c0_i32 : i32, i32
  }
}

</mosaic_0001>

<bundles_post_ra>
// kernel: sentcnn_forward.1
= control target key start
LH: loop header
LB: loop body
LE: loop exit
PB: predicated region body
PF: predicated region fallthrough
CT: control target
= control target key end

     0   :  { %v3070_v1 = vmov 0.0   ;;  %v3071_v2 = vmov 0   ;;  %vm3072_vm0 = vmmov 0   ;;  %v3073_v60 = vmov 1983009808   ;;  %s4035_s1 = inlined_call_operand.vmem [shape: bf16[128,384], index: 1, kind: input, shape index: {}]   ;;  %s4036_s0 = inlined_call_operand.vmem [shape: f32[8,2,4,384], index: 0, kind: input, shape index: {}]   ;;  %s4037_s2 = inlined_call_operand.vmem [shape: f32[1,128], index: 2, kind: input, shape index: {}]   ;;  %s4038_s3 = inlined_call_operand.vmem [shape: bf16[128,128], index: 3, kind: input, shape index: {}]   ;;  %s4039_s5 = inlined_call_operand.vmem [shape: bf16[256,128], index: 5, kind: input, shape index: {}]   ;;  %s4040_s7 = inlined_call_operand.vmem [shape: bf16[384,128], index: 7, kind: input, shape index: {}]   ;;  %s4041_s10 = inlined_call_operand.<no memory space> [shape: f32[1,1], index: 10, kind: input, shape index: {}]   ;;  %s4042_s6 = inlined_call_operand.vmem [shape: f32[1,128], index: 6, kind: input, shape index: {}]   ;;  %s4043_s4 = inlined_call_operand.vmem [shape: f32[1,128], index: 4, kind: input, shape index: {}]   ;;  %s4044_s8 = inlined_call_operand.vmem [shape: f32[1,128], index: 8, kind: input, shape index: {}]   ;;  %s4045_s9 = inlined_call_operand.vmem [shape: f32[1,384], index: 9, kind: input, shape index: {}]   ;;  %s4046_s11 = inlined_call_operand.vmem [shape: f32[2,1], index: 11, kind: output, shape index: {}]  }
   0x1   :  { %v3138_v0 = vld [vmem:[%s4035_s1 + $0x4] ss:$12 sps:$4 sm:$0xff]   ;;  %2660 = vmatprep.subr.bf16.mxu1 %v3070_v1  ;;  %238 = vmatprep.mubr.bf16.mxu0 %v3071_v2  ;;  %v3145_v3 = vld [vmem:[%s4035_s1] ss:$12 sps:$4 sm:$0xff]   ;;  %v3153_v4 = vld [vmem:[%s4035_s1 + $0x1c] ss:$12 sps:$4 sm:$0xff]   ;;  %v349_v61 = vunpack.c.l.s4 %v3073_v60  ;;  %v351_v62 = vlaneseq }
   0x2   :  { %2676 = vmatprep.mubr.msk.bf16.mxu1 %vm3072_vm0, %v3070_v1  ;;  %206 = vmatprep.subr.bf16.mxu0 %v3138_v0  ;;  %v3159_v5 = vld [vmem:[%s4035_s1 + $0x18] ss:$12 sps:$4 sm:$0xff]   ;;  %v3165_v6 = vld [vmem:[%s4035_s1 + $0x34] ss:$12 sps:$4 sm:$0xff]   ;;  %v3171_v7 = vld [vmem:[%s4035_s1 + $0x30] ss:$12 sps:$4 sm:$0xff]  }
   0x3   :  { %207 = vmatpush1.bf16.msra.mxu0 %v3145_v3  ;;  %v3177_v8 = vld [vmem:[%s4035_s1 + $0x4c] ss:$12 sps:$4 sm:$0xff]   ;;  %v3182_v9 = vld [vmem:[%s4035_s1 + $0x8] ss:$12 sps:$4 sm:$0xff]   ;;  %v3193_v11 = vld [vmem:[%s4035_s1 + $0x64] ss:$12 sps:$4 sm:$0xff]  }
   0x4   :  { %208 = vmatprep.subr.bf16.mxu0 %v3153_v4  ;;  %v3188_v10 = vld [vmem:[%s4035_s1 + $0x48] ss:$12 sps:$4 sm:$0xff]   ;;  %2661 = vmatpush3.bf16.msra.mxu1 %v3182_v9  ;;  %v3200_v12 = vld [vmem:[%s4035_s1 + $0x20] ss:$12 sps:$4 sm:$0xff]   ;;  %v3219_v15 = vld [vmem:[%s4035_s1 + $0x38] ss:$12 sps:$4 sm:$0xff]  }
   0x5   :  { %2662 = vmatprep.subr.bf16.mxu1 %v3070_v1  ;;  %v3206_v13 = vld [vmem:[%s4035_s1 + $0x60] ss:$12 sps:$4 sm:$0xff]   ;;  %v3212_v14 = vld [vmem:[%s4035_s1 + $0x7c] ss:$12 sps:$4 sm:$0xff]   ;;  %v3226_v16 = vld [vmem:[%s4035_s1 + $0x78] ss:$12 sps:$4 sm:$0xff]  }
   0x6   :  { %v3232_v17 = vld [vmem:[%s4035_s1 + $0x94] ss:$12 sps:$4 sm:$0xff]   ;;  %v3238_v18 = vld [vmem:[%s4035_s1 + $0x50] ss:$12 sps:$4 sm:$0xff]   ;;  %v3251_v20 = vld [vmem:[%s4035_s1 + $0xac] ss:$12 sps:$4 sm:$0xff]  }
   0x7   :  { %209 = vmatpush1.bf16.msra.mxu0 %v3159_v5  ;;  %v3245_v19 = vld [vmem:[%s4035_s1 + $0x90] ss:$12 sps:$4 sm:$0xff]   ;;  %v3257_v21 = vld [vmem:[%s4035_s1 + $0x68] ss:$12 sps:$4 sm:$0xff]   ;;  %v3271_v23 = vld [vmem:[%s4035_s1 + $0x80] ss:$12 sps:$4 sm:$0xff]  }
   0x8   :  { %210 = vmatprep.subr.bf16.mxu0 %v3165_v6  ;;  %2663 = vmatpush3.bf16.msra.mxu1 %v3200_v12  ;;  %v3264_v22 = vld [vmem:[%s4035_s1 + $0xa8] ss:$12 sps:$4 sm:$0xff]   ;;  %v3279_v24 = vld [vmem:[%s4035_s1 + $0x98] ss:$12 sps:$4 sm:$0xff]   ;;  %v3290_v25 = vld [vmem:[%s4035_s1 + $0xb0] ss:$12 sps:$4 sm:$0xff]  }
   0x9   :  { %2664 = vmatprep.subr.bf16.mxu1 %v3070_v1  ;;  %v74_v27 = vld [vmem:[%s4036_s0] sm:$0xff]  ;;  %v76_v28 = vld [vmem:[%s4036_s0 + $0xc] sm:$0xff]  ;;  %v75_v51 = vld [vmem:[%s4036_s0 + $0x8] sm:$0xf]  ;;  %vm1476_vm1 = vcmask 1043456   ;;  %vm1945_vm2 = vcmask 1042432  }
   0xa   :  { %v3338_v47 = vld [vmem:[%s4037_s2] ss:$0 sm:$0xff]  ;;  %v77_v53 = vld [vmem:[%s4036_s0 + $0x14] sm:$0xf]  ;;  %vm2336_vm3 = vcmask 1041409   ;;  %vm2319_vm4 = vcmask 1041408  }
   0xb   :  { %211 = vmatpush1.bf16.msra.mxu0 %v3171_v7  ;;  %vm2388_vm5 = vcmask 1024  }
   0xc   :  { %212 = vmatprep.subr.bf16.mxu0 %v3177_v8  ;;  %2665 = vmatpush3.bf16.msra.mxu1 %v3219_v15 }
   0xd   :  { %2666 = vmatprep.subr.bf16.mxu1 %v3070_v1 }
   0xf   :  { %213 = vmatpush1.bf16.msra.mxu0 %v3188_v10 }
  0x10   :  { %214 = vmatprep.subr.bf16.mxu0 %v3193_v11  ;;  %2667 = vmatpush3.bf16.msra.mxu1 %v3238_v18 }
  0x11   :  { %2668 = vmatprep.subr.bf16.mxu1 %v3070_v1 }
  0x13   :  { %215 = vmatpush1.bf16.msra.mxu0 %v3206_v13 }
  0x14   :  { %216 = vmatprep.subr.bf16.mxu0 %v3212_v14  ;;  %2669 = vmatpush3.bf16.msra.mxu1 %v3257_v21 }
  0x15   :  { %2670 = vmatprep.subr.bf16.mxu1 %v3070_v1 }
  0x17   :  { %217 = vmatpush1.bf16.msra.mxu0 %v3226_v16 }
  0x18   :  { %218 = vmatprep.subr.bf16.mxu0 %v3232_v17  ;;  %2671 = vmatpush3.bf16.msra.mxu1 %v3271_v23 }
  0x19   :  { %2672 = vmatprep.subr.bf16.mxu1 %v3070_v1 }
  0x1b   :  { %219 = vmatpush1.bf16.msra.mxu0 %v3245_v19 }
  0x1c   :  { %220 = vmatprep.subr.bf16.mxu0 %v3251_v20  ;;  %2673 = vmatpush3.bf16.msra.mxu1 %v3279_v24 }
  0x1d   :  { %2674 = vmatprep.subr.bf16.mxu1 %v3070_v1 }
  0x1f   :  { %221 = vmatpush1.bf16.msra.mxu0 %v3264_v22 }
  0x20   :  { %356 = vmatprep.subr.bf16.mxu0 %v3138_v0  ;;  %2675 = vmatpush3.bf16.msra.mxu1 %v3290_v25 }
  0x21   :  { %2680 = vmatprep.subr.bf16.mxu1 %v3070_v1 }
  0x22   :  { %239 = vmatmul.mubr.bf16.vlgmr.msra.gmra.mrb[0].mxu0 %v3071_v2 }
  0x23   :  { %357 = vmatpush1.bf16.msra.mxu0 %v3145_v3  ;;  %388 = vmatprep.mubr.bf16.mxu0 %v3071_v2 }
  0x24   :  { %358 = vmatprep.subr.bf16.mxu0 %v3153_v4  ;;  %2677 = vmatmul.mubr.bf16.vlgmr.msra.gmra.mrb[0].mxu1 %v3071_v2 }
  0x25   :  { %2681 = vmatpush3.bf16.msra.mxu1 %v3182_v9  ;;  %2696 = vmatprep.mubr.msk.bf16.mxu1 %vm3072_vm0, %v3070_v1 }
  0x26   :  { %2682 = vmatprep.subr.bf16.mxu1 %v3070_v1 }
  0x27   :  { %359 = vmatpush1.bf16.msra.mxu0 %v3159_v5 }
  0x28   :  { %360 = vmatprep.subr.bf16.mxu0 %v3165_v6 }
  0x29   :  { %2683 = vmatpush3.bf16.msra.mxu1 %v3200_v12 }
  0x2a   :  { %2684 = vmatprep.subr.bf16.mxu1 %v3070_v1 }
  0x2b   :  { %361 = vmatpush1.bf16.msra.mxu0 %v3171_v7 }
  0x2c   :  { %362 = vmatprep.subr.bf16.mxu0 %v3177_v8 }
  0x2d   :  { %2685 = vmatpush3.bf16.msra.mxu1 %v3219_v15 }
  0x2e   :  { %2686 = vmatprep.subr.bf16.mxu1 %v3070_v1 }
  0x2f   :  { %363 = vmatpush1.bf16.msra.mxu0 %v3188_v10 }
  0x30   :  { %364 = vmatprep.subr.bf16.mxu0 %v3193_v11 }
  0x31   :  { %2687 = vmatpush3.bf16.msra.mxu1 %v3238_v18 }
  0x32   :  { %2688 = vmatprep.subr.bf16.mxu1 %v3070_v1 }
  0x33   :  { %365 = vmatpush1.bf16.msra.mxu0 %v3206_v13 }
  0x34   :  { %366 = vmatprep.subr.bf16.mxu0 %v3212_v14 }
  0x35   :  { %2689 = vmatpush3.bf16.msra.mxu1 %v3257_v21 }
  0x36   :  { %2690 = vmatprep.subr.bf16.mxu1 %v3070_v1 }
  0x37   :  { %367 = vmatpush1.bf16.msra.mxu0 %v3226_v16 }
  0x38   :  { %368 = vmatprep.subr.bf16.mxu0 %v3232_v17 }
  0x39   :  { %2691 = vmatpush3.bf16.msra.mxu1 %v3271_v23 }
  0x3a   :  { %2692 = vmatprep.subr.bf16.mxu1 %v3070_v1 }
  0x3b   :  { %369 = vmatpush1.bf16.msra.mxu0 %v3245_v19 }
  0x3c   :  { %370 = vmatprep.subr.bf16.mxu0 %v3251_v20 }
  0x3d   :  { %2693 = vmatpush3.bf16.msra.mxu1 %v3279_v24 }
  0x3e   :  { %2694 = vmatprep.subr.bf16.mxu1 %v3070_v1 }
  0x3f   :  { %371 = vmatpush1.bf16.msra.mxu0 %v3264_v22 }
  0x40   :  { %500 = vmatprep.subr.bf16.mxu0 %v3138_v0 }
  0x41   :  { %2695 = vmatpush3.bf16.msra.mxu1 %v3290_v25 }
  0x42   :  { %2700 = vmatprep.subr.bf16.mxu1 %v3070_v1 }
  0xf5   :  { %v240_v26 = vpop.f32.mrb[0].mxu0 }
  0xf6   :  { %v242_v29 = vpop.f32.mrb[1].mxu0 }
  0xf7   :  { %v290_v30 = vcombine.low %v240_v26, %v242_v29  ;;  %v291_v31 = vcombine.high %v240_v26, %v242_v29  ;;  %v244_v32 = vpop.f32.mrb[2].mxu0  ;;  %v281_v38 = vpop.f32.mrb[0].mxu1  ;;  %v3348_v29 = vshrl.u32 %v351_v62, 7 }
  0xf8   :  { %v245_v33 = vpop.f32.mrb[3].mxu0  ;;  %v2678_v39 = vpop.f32.mrb[1].mxu1  ;;  %v292_v46 = vcombine.high %v281_v38, %v281_v38  ;;  %v316_v49 = vadd.f32 %v3338_v47, %v281_v38 }
  0xf9   :  { %v296_v34 = vadd.f32 %v290_v30, %v74_v27  ;;  %v297_v35 = vadd.f32 %v291_v31, %v76_v28  ;;  %v284_v40 = vpop.f32.mrb[2].mxu1  ;;  %v350_v28 = vunpack.c.0.s8 %v349_v61 }
  0xfa   :  { %v2679_v41 = vpop.f32.mrb[3].mxu1  ;;  %v317_v48 = vadd.f32 %v3338_v47, %v292_v46 }
  0xfb   :  { %v2418_v36 = vmul.f32 -1.442695, %v296_v34  ;;  %v2419_v37 = vmul.f32 -1.442695, %v297_v35 }
  0xfd   :  { %2945 = vpow2.f32 %v2418_v36 }
  0xfe   :  { %2947 = vpow2.f32 %v2419_v37  ;;  %v3355_v37 = vsub.s32 %v350_v28, %v3348_v29 }
 0x107   :  { %v2946_v42 = vpop.eup %2945 }
 0x108   :  { %v2948_v43 = vpop.eup %2947  ;;  %v304_v44 = vadd.f32 1.0, %v2946_v42  ;;  %v2421_v42 = vld [vmem:[%s4036_s0 + $0x18] sm:$0xff] }
 0x109   :  { %v305_v45 = vadd.f32 1.0, %v2948_v43  ;;  %v2423_v43 = vld [vmem:[%s4036_s0 + $0x24] sm:$0xff] }
 0x10a   :  { %2949 = vrcp.f32 %v304_v44 }
 0x10b   :  { %2951 = vrcp.f32 %v305_v45 }
 0x114   :  { %v2950_v50 = vpop.eup %2949 }
 0x115   :  { %v2952_v52 = vpop.eup %2951  ;;  %v318_v54 = vmul.f32 %v2950_v50, %v316_v49  ;;  %v326_v58 = vrot.slane %v2950_v50, 4 }
 0x116   :  { %v319_v55 = vmul.f32 %v2952_v52, %v317_v48  ;;  %v327_v59 = vrot.slane %v2952_v52, 4 }
 0x117   :  { %v320_v56 = vadd.f32 %v318_v54, %v75_v51  ;;  %v330_v63 = vsub.f32 1.0, %v326_v58  ;;  %v334_v32 = vmul.f32 0.0, %v326_v58 }
 0x118   :  { %v321_v57 = vadd.f32 %v319_v55, %v77_v53  ;;  %v331_v27 = vsub.f32 1.0, %v327_v59  ;;  %v335_v34 = vmul.f32 0.0, %v327_v59 }
 0x119   :  { %2953 = vtanh.f32 %v320_v56 }
 0x11a   :  { %2955 = vtanh.f32 %v321_v57 }
 0x123   :  { %v2954_v26 = vpop.eup %2953 }
 0x124   :  { %v2956_v30 = vpop.eup %2955  ;;  %v332_v31 = vmul.f32 %v2954_v26, %v330_v63 }
 0x125   :  { %v333_v33 = vmul.f32 %v2956_v30, %v331_v27  ;;  %v2422_v27 = vld [vmem:[%s4036_s0 + $0x20] sm:$0xf]  ;;  %v2424_v30 = vld [vmem:[%s4036_s0 + $0x2c] sm:$0xf] }
 0x126   :  { %v3350_v35 = vadd.f32 %v334_v32, %v332_v31 }
 0x127   :  { %v3352_v36 = vadd.f32 %v335_v34, %v333_v33 }
 0x129   :  { %v2425_v38 = vpack.c.bf16 %v3352_v36, %v3350_v35 }
 0x12b   :  { %v354_v39 = vrot.slane %v2425_v38, %v3355_v37 }
 0x12d   :  { %389 = vmatmul.mubr.bf16.vlgmr.msra.gmra.mrb[4].mxu0 %v354_v39  ;;  %2697 = vmatmul.mubr.bf16.vlgmr.msra.gmra.mrb[4].mxu1 %v354_v39 }
 0x12e   :  { %501 = vmatpush1.bf16.msra.mxu0 %v3145_v3  ;;  %2701 = vmatpush3.bf16.msra.mxu1 %v3182_v9 }
 0x12f   :  { %502 = vmatprep.subr.bf16.mxu0 %v3153_v4  ;;  %2702 = vmatprep.subr.bf16.mxu1 %v3070_v1 }
 0x130   :  { %532 = vmatprep.mubr.bf16.mxu0 %v3071_v2  ;;  %2716 = vmatprep.mubr.msk.bf16.mxu1 %vm3072_vm0, %v3070_v1 }
 0x132   :  { %503 = vmatpush1.bf16.msra.mxu0 %v3159_v5  ;;  %2703 = vmatpush3.bf16.msra.mxu1 %v3200_v12 }
 0x133   :  { %504 = vmatprep.subr.bf16.mxu0 %v3165_v6  ;;  %2704 = vmatprep.subr.bf16.mxu1 %v3070_v1 }
 0x136   :  { %505 = vmatpush1.bf16.msra.mxu0 %v3171_v7  ;;  %2705 = vmatpush3.bf16.msra.mxu1 %v3219_v15 }
 0x137   :  { %506 = vmatprep.subr.bf16.mxu0 %v3177_v8  ;;  %2706 = vmatprep.subr.bf16.mxu1 %v3070_v1 }
 0x13a   :  { %507 = vmatpush1.bf16.msra.mxu0 %v3188_v10  ;;  %2707 = vmatpush3.bf16.msra.mxu1 %v3238_v18 }
 0x13b   :  { %508 = vmatprep.subr.bf16.mxu0 %v3193_v11  ;;  %2708 = vmatprep.subr.bf16.mxu1 %v3070_v1 }
 0x13e   :  { %509 = vmatpush1.bf16.msra.mxu0 %v3206_v13  ;;  %2709 = vmatpush3.bf16.msra.mxu1 %v3257_v21 }
 0x13f   :  { %510 = vmatprep.subr.bf16.mxu0 %v3212_v14  ;;  %2710 = vmatprep.subr.bf16.mxu1 %v3070_v1 }
 0x142   :  { %511 = vmatpush1.bf16.msra.mxu0 %v3226_v16  ;;  %2711 = vmatpush3.bf16.msra.mxu1 %v3271_v23 }
 0x143   :  { %512 = vmatprep.subr.bf16.mxu0 %v3232_v17  ;;  %2712 = vmatprep.subr.bf16.mxu1 %v3070_v1 }
 0x146   :  { %513 = vmatpush1.bf16.msra.mxu0 %v3245_v19  ;;  %2713 = vmatpush3.bf16.msra.mxu1 %v3279_v24 }
 0x147   :  { %514 = vmatprep.subr.bf16.mxu0 %v3251_v20  ;;  %2714 = vmatprep.subr.bf16.mxu1 %v3070_v1 }
 0x14a   :  { %515 = vmatpush1.bf16.msra.mxu0 %v3264_v22  ;;  %2715 = vmatpush3.bf16.msra.mxu1 %v3290_v25 }
 0x14b   :  { %644 = vmatprep.subr.bf16.mxu0 %v3138_v0  ;;  %2720 = vmatprep.subr.bf16.mxu1 %v3070_v1 }
 0x200   :  { %v390_v40 = vpop.f32.mrb[4].mxu0  ;;  %v431_v41 = vpop.f32.mrb[4].mxu1 }
 0x201   :  { %v392_v44 = vpop.f32.mrb[5].mxu0  ;;  %v2698_v45 = vpop.f32.mrb[5].mxu1  ;;  %v442_v61 = vcombine.high %v431_v41, %v431_v41  ;;  %v460_v62 = vadd.f32 %v3338_v47, %v431_v41 }
 0x202   :  { %v440_v46 = vcombine.low %v390_v40, %v392_v44  ;;  %v441_v48 = vcombine.high %v390_v40, %v392_v44  ;;  %v394_v49 = vpop.f32.mrb[6].mxu0  ;;  %v434_v50 = vpop.f32.mrb[6].mxu1 }
 0x203   :  { %v395_v51 = vpop.f32.mrb[7].mxu0  ;;  %v2699_v52 = vpop.f32.mrb[7].mxu1  ;;  %v461_v26 = vadd.f32 %v3338_v47, %v442_v61 }
 0x204   :  { %v446_v53 = vadd.f32 %v2421_v42, %v440_v46  ;;  %v447_v54 = vadd.f32 %v2423_v43, %v441_v48 }
 0x206   :  { %v2426_v55 = vmul.f32 -1.442695, %v446_v53  ;;  %v2427_v56 = vmul.f32 -1.442695, %v447_v54  ;;  %v2428_v53 = vld [vmem:[%s4036_s0 + $0x30] sm:$0xff]  ;;  %v2430_v54 = vld [vmem:[%s4036_s0 + $0x3c] sm:$0xff] }
 0x208   :  { %2957 = vpow2.f32 %v2426_v55 }
 0x209   :  { %2959 = vpow2.f32 %v2427_v56 }
 0x212   :  { %v2958_v57 = vpop.eup %2957 }
 0x213   :  { %v2960_v58 = vpop.eup %2959  ;;  %v454_v59 = vadd.f32 1.0, %v2958_v57 }
 0x214   :  { %v455_v60 = vadd.f32 1.0, %v2960_v58 }
 0x215   :  { %2961 = vrcp.f32 %v454_v59 }
 0x216   :  { %2963 = vrcp.f32 %v455_v60 }
 0x21f   :  { %v2962_v63 = vpop.eup %2961 }
 0x220   :  { %v2964_v28 = vpop.eup %2963  ;;  %v462_v31 = vmul.f32 %v2962_v63, %v460_v62  ;;  %v470_v38 = vrot.slane %v2962_v63, 4 }
 0x221   :  { %v463_v32 = vmul.f32 %v2964_v28, %v461_v26  ;;  %v471_v39 = vrot.slane %v2964_v28, 4 }
 0x222   :  { %v464_v33 = vadd.f32 %v2422_v27, %v462_v31  ;;  %v474_v40 = vsub.f32 1.0, %v470_v38  ;;  %v478_v45 = vmul.f32 %v470_v38, %v3350_v35 }
 0x223   :  { %v465_v34 = vadd.f32 %v2424_v30, %v463_v32  ;;  %v475_v42 = vsub.f32 1.0, %v471_v39  ;;  %v479_v48 = vmul.f32 %v471_v39, %v3352_v36 }
 0x224   :  { %2965 = vtanh.f32 %v464_v33 }
 0x225   :  { %2967 = vtanh.f32 %v465_v34 }
 0x22e   :  { %v2966_v41 = vpop.eup %2965 }
 0x22f   :  { %v2968_v43 = vpop.eup %2967  ;;  %v476_v44 = vmul.f32 %v2966_v41, %v474_v40  ;;  %v2429_v41 = vld [vmem:[%s4036_s0 + $0x38] sm:$0xf] }
 0x230   :  { %v477_v46 = vmul.f32 %v2968_v43, %v475_v42  ;;  %v2431_v43 = vld [vmem:[%s4036_s0 + $0x44] sm:$0xf] }
 0x231   :  { %v3411_v49 = vadd.f32 %v478_v45, %v476_v44 }
 0x232   :  { %v3413_v50 = vadd.f32 %v479_v48, %v477_v46 }
 0x234   :  { %v2432_v51 = vpack.c.bf16 %v3413_v50, %v3411_v49 }
 0x236   :  { %v498_v52 = vrot.slane %v2432_v51, %v3355_v37 }
 0x238   :  { %533 = vmatmul.mubr.bf16.vlgmr.msra.gmra.mrb[8].mxu0 %v498_v52  ;;  %2717 = vmatmul.mubr.bf16.vlgmr.msra.gmra.mrb[8].mxu1 %v498_v52 }
 0x239   :  { %645 = vmatpush1.bf16.msra.mxu0 %v3145_v3  ;;  %2721 = vmatpush3.bf16.msra.mxu1 %v3182_v9 }
 0x23a   :  { %646 = vmatprep.subr.bf16.mxu0 %v3153_v4  ;;  %2722 = vmatprep.subr.bf16.mxu1 %v3070_v1 }
 0x23b   :  { %676 = vmatprep.mubr.bf16.mxu0 %v3071_v2  ;;  %2736 = vmatprep.mubr.msk.bf16.mxu1 %vm3072_vm0, %v3070_v1 }
 0x23d   :  { %647 = vmatpush1.bf16.msra.mxu0 %v3159_v5  ;;  %2723 = vmatpush3.bf16.msra.mxu1 %v3200_v12 }
 0x23e   :  { %648 = vmatprep.subr.bf16.mxu0 %v3165_v6  ;;  %2724 = vmatprep.subr.bf16.mxu1 %v3070_v1 }
 0x241   :  { %649 = vmatpush1.bf16.msra.mxu0 %v3171_v7  ;;  %2725 = vmatpush3.bf16.msra.mxu1 %v3219_v15 }
 0x242   :  { %650 = vmatprep.subr.bf16.mxu0 %v3177_v8  ;;  %2726 = vmatprep.subr.bf16.mxu1 %v3070_v1 }
 0x245   :  { %651 = vmatpush1.bf16.msra.mxu0 %v3188_v10  ;;  %2727 = vmatpush3.bf16.msra.mxu1 %v3238_v18 }
 0x246   :  { %652 = vmatprep.subr.bf16.mxu0 %v3193_v11  ;;  %2728 = vmatprep.subr.bf16.mxu1 %v3070_v1 }
 0x249   :  { %653 = vmatpush1.bf16.msra.mxu0 %v3206_v13  ;;  %2729 = vmatpush3.bf16.msra.mxu1 %v3257_v21 }
 0x24a   :  { %654 = vmatprep.subr.bf16.mxu0 %v3212_v14  ;;  %2730 = vmatprep.subr.bf16.mxu1 %v3070_v1 }
 0x24d   :  { %655 = vmatpush1.bf16.msra.mxu0 %v3226_v16  ;;  %2731 = vmatpush3.bf16.msra.mxu1 %v3271_v23 }
 0x24e   :  { %656 = vmatprep.subr.bf16.mxu0 %v3232_v17  ;;  %2732 = vmatprep.subr.bf16.mxu1 %v3070_v1 }
 0x251   :  { %657 = vmatpush1.bf16.msra.mxu0 %v3245_v19  ;;  %2733 = vmatpush3.bf16.msra.mxu1 %v3279_v24 }
 0x252   :  { %658 = vmatprep.subr.bf16.mxu0 %v3251_v20  ;;  %2734 = vmatprep.subr.bf16.mxu1 %v3070_v1 }
 0x255   :  { %659 = vmatpush1.bf16.msra.mxu0 %v3264_v22  ;;  %2735 = vmatpush3.bf16.msra.mxu1 %v3290_v25 }
 0x256   :  { %788 = vmatprep.subr.bf16.mxu0 %v3138_v0  ;;  %2740 = vmatprep.subr.bf16.mxu1 %v3070_v1 }
 0x30b   :  { %v534_v35 = vpop.f32.mrb[8].mxu0  ;;  %v575_v36 = vpop.f32.mrb[8].mxu1 }
 0x30c   :  { %v536_v55 = vpop.f32.mrb[9].mxu0  ;;  %v2718_v56 = vpop.f32.mrb[9].mxu1  ;;  %v586_v34 = vcombine.high %v575_v36, %v575_v36  ;;  %v604_v38 = vadd.f32 %v3338_v47, %v575_v36 }
 0x30d   :  { %v584_v57 = vcombine.low %v534_v35, %v536_v55  ;;  %v585_v58 = vcombine.high %v534_v35, %v536_v55  ;;  %v538_v59 = vpop.f32.mrb[10].mxu0  ;;  %v578_v60 = vpop.f32.mrb[10].mxu1 }
 0x30e   :  { %v539_v61 = vpop.f32.mrb[11].mxu0  ;;  %v2719_v62 = vpop.f32.mrb[11].mxu1  ;;  %v605_v40 = vadd.f32 %v3338_v47, %v586_v34 }
 0x30f   :  { %v590_v63 = vadd.f32 %v2428_v53, %v584_v57  ;;  %v591_v26 = vadd.f32 %v2430_v54, %v585_v58 }
 0x311   :  { %v2433_v27 = vmul.f32 -1.442695, %v590_v63  ;;  %v2434_v28 = vmul.f32 -1.442695, %v591_v26  ;;  %v2435_v63 = vld [vmem:[%s4036_s0 + $0x48] sm:$0xff]  ;;  %v2437_v26 = vld [vmem:[%s4036_s0 + $0x54] sm:$0xff] }
 0x313   :  { %2969 = vpow2.f32 %v2433_v27 }
 0x314   :  { %2971 = vpow2.f32 %v2434_v28 }
 0x31d   :  { %v2970_v30 = vpop.eup %2969 }
 0x31e   :  { %v2972_v31 = vpop.eup %2971  ;;  %v598_v32 = vadd.f32 1.0, %v2970_v30 }
 0x31f   :  { %v599_v33 = vadd.f32 1.0, %v2972_v31 }
 0x320   :  { %2973 = vrcp.f32 %v598_v32 }
 0x321   :  { %2975 = vrcp.f32 %v599_v33 }
 0x32a   :  { %v2974_v39 = vpop.eup %2973 }
 0x32b   :  { %v2976_v42 = vpop.eup %2975  ;;  %v606_v44 = vmul.f32 %v2974_v39, %v604_v38  ;;  %v614_v51 = vrot.slane %v2974_v39, 4 }
 0x32c   :  { %v607_v45 = vmul.f32 %v2976_v42, %v605_v40  ;;  %v615_v52 = vrot.slane %v2976_v42, 4 }
 0x32d   :  { %v608_v46 = vadd.f32 %v2429_v41, %v606_v44  ;;  %v618_v35 = vsub.f32 1.0, %v614_v51  ;;  %v622_v56 = vmul.f32 %v614_v51, %v3411_v49 }
 0x32e   :  { %v609_v48 = vadd.f32 %v2431_v43, %v607_v45  ;;  %v619_v53 = vsub.f32 1.0, %v615_v52  ;;  %v623_v58 = vmul.f32 %v615_v52, %v3413_v50 }
 0x32f   :  { %2977 = vtanh.f32 %v608_v46 }
 0x330   :  { %2979 = vtanh.f32 %v609_v48 }
 0x339   :  { %v2978_v36 = vpop.eup %2977 }
 0x33a   :  { %v2980_v54 = vpop.eup %2979  ;;  %v620_v55 = vmul.f32 %v2978_v36, %v618_v35  ;;  %v2436_v36 = vld [vmem:[%s4036_s0 + $0x50] sm:$0xf] }
 0x33b   :  { %v621_v57 = vmul.f32 %v2980_v54, %v619_v53  ;;  %v2438_v54 = vld [vmem:[%s4036_s0 + $0x5c] sm:$0xf] }
 0x33c   :  { %v3469_v59 = vadd.f32 %v622_v56, %v620_v55 }
 0x33d   :  { %v3471_v60 = vadd.f32 %v623_v58, %v621_v57 }
 0x33f   :  { %v2439_v61 = vpack.c.bf16 %v3471_v60, %v3469_v59 }
 0x341   :  { %v642_v62 = vrot.slane %v2439_v61, %v3355_v37 }
 0x343   :  { %677 = vmatmul.mubr.bf16.vlgmr.msra.gmra.mrb[12].mxu0 %v642_v62  ;;  %2737 = vmatmul.mubr.bf16.vlgmr.msra.gmra.mrb[12].mxu1 %v642_v62 }
 0x344   :  { %789 = vmatpush1.bf16.msra.mxu0 %v3145_v3  ;;  %2741 = vmatpush3.bf16.msra.mxu1 %v3182_v9 }
 0x345   :  { %790 = vmatprep.subr.bf16.mxu0 %v3153_v4  ;;  %2742 = vmatprep.subr.bf16.mxu1 %v3070_v1 }
 0x346   :  { %820 = vmatprep.mubr.bf16.mxu0 %v3071_v2  ;;  %2756 = vmatprep.mubr.msk.bf16.mxu1 %vm3072_vm0, %v3070_v1 }
 0x348   :  { %791 = vmatpush1.bf16.msra.mxu0 %v3159_v5  ;;  %2743 = vmatpush3.bf16.msra.mxu1 %v3200_v12 }
 0x349   :  { %792 = vmatprep.subr.bf16.mxu0 %v3165_v6  ;;  %2744 = vmatprep.subr.bf16.mxu1 %v3070_v1 }
 0x34c   :  { %793 = vmatpush1.bf16.msra.mxu0 %v3171_v7  ;;  %2745 = vmatpush3.bf16.msra.mxu1 %v3219_v15 }
 0x34d   :  { %794 = vmatprep.subr.bf16.mxu0 %v3177_v8  ;;  %2746 = vmatprep.subr.bf16.mxu1 %v3070_v1 }
 0x350   :  { %795 = vmatpush1.bf16.msra.mxu0 %v3188_v10  ;;  %2747 = vmatpush3.bf16.msra.mxu1 %v3238_v18 }
 0x351   :  { %796 = vmatprep.subr.bf16.mxu0 %v3193_v11  ;;  %2748 = vmatprep.subr.bf16.mxu1 %v3070_v1 }
 0x354   :  { %797 = vmatpush1.bf16.msra.mxu0 %v3206_v13  ;;  %2749 = vmatpush3.bf16.msra.mxu1 %v3257_v21 }
 0x355   :  { %798 = vmatprep.subr.bf16.mxu0 %v3212_v14  ;;  %2750 = vmatprep.subr.bf16.mxu1 %v3070_v1 }
 0x358   :  { %799 = vmatpush1.bf16.msra.mxu0 %v3226_v16  ;;  %2751 = vmatpush3.bf16.msra.mxu1 %v3271_v23 }
 0x359   :  { %800 = vmatprep.subr.bf16.mxu0 %v3232_v17  ;;  %2752 = vmatprep.subr.bf16.mxu1 %v3070_v1 }
 0x35c   :  { %801 = vmatpush1.bf16.msra.mxu0 %v3245_v19  ;;  %2753 = vmatpush3.bf16.msra.mxu1 %v3279_v24 }
 0x35d   :  { %802 = vmatprep.subr.bf16.mxu0 %v3251_v20  ;;  %2754 = vmatprep.subr.bf16.mxu1 %v3070_v1 }
 0x360   :  { %803 = vmatpush1.bf16.msra.mxu0 %v3264_v22  ;;  %2755 = vmatpush3.bf16.msra.mxu1 %v3290_v25 }
 0x361   :  { %932 = vmatprep.subr.bf16.mxu0 %v3138_v0  ;;  %2760 = vmatprep.subr.bf16.mxu1 %v3070_v1 }
 0x416   :  { %v678_v49 = vpop.f32.mrb[12].mxu0  ;;  %v719_v50 = vpop.f32.mrb[12].mxu1 }
 0x417   :  { %v680_v27 = vpop.f32.mrb[13].mxu0  ;;  %v2738_v28 = vpop.f32.mrb[13].mxu1  ;;  %v730_v48 = vcombine.high %v719_v50, %v719_v50  ;;  %v748_v51 = vadd.f32 %v3338_v47, %v719_v50 }
 0x418   :  { %v728_v30 = vcombine.low %v678_v49, %v680_v27  ;;  %v729_v31 = vcombine.high %v678_v49, %v680_v27  ;;  %v682_v32 = vpop.f32.mrb[14].mxu0  ;;  %v722_v33 = vpop.f32.mrb[14].mxu1 }
 0x419   :  { %v683_v34 = vpop.f32.mrb[15].mxu0  ;;  %v2739_v38 = vpop.f32.mrb[15].mxu1  ;;  %v749_v35 = vadd.f32 %v3338_v47, %v730_v48 }
 0x41a   :  { %v734_v39 = vadd.f32 %v2435_v63, %v728_v30  ;;  %v735_v40 = vadd.f32 %v2437_v26, %v729_v31 }
 0x41c   :  { %v2440_v41 = vmul.f32 -1.442695, %v734_v39  ;;  %v2441_v42 = vmul.f32 -1.442695, %v735_v40 }
 0x41e   :  { %2981 = vpow2.f32 %v2440_v41 }
 0x41f   :  { %2983 = vpow2.f32 %v2441_v42 }
 0x428   :  { %v2982_v43 = vpop.eup %2981 }
 0x429   :  { %v2984_v44 = vpop.eup %2983  ;;  %v742_v45 = vadd.f32 1.0, %v2982_v43 }
 0x42a   :  { %v743_v46 = vadd.f32 1.0, %v2984_v44 }
 0x42b   :  { %2985 = vrcp.f32 %v742_v45 }
 0x42c   :  { %2987 = vrcp.f32 %v743_v46 }
 0x435   :  { %v2986_v52 = vpop.eup %2985 }
 0x436   :  { %v2988_v53 = vpop.eup %2987  ;;  %v750_v55 = vmul.f32 %v2986_v52, %v748_v51  ;;  %v758_v61 = vrot.slane %v2986_v52, 4 }
 0x437   :  { %v751_v56 = vmul.f32 %v2988_v53, %v749_v35  ;;  %v759_v62 = vrot.slane %v2988_v53, 4  ;;  %v2443_v53 = vld [vmem:[%s4036_s0 + $0x68] sm:$0xf] }
 0x438   :  { %v752_v57 = vadd.f32 %v2436_v36, %v750_v55  ;;  %v762_v49 = vsub.f32 1.0, %v758_v61  ;;  %v766_v28 = vmul.f32 %v758_v61, %v3469_v59  ;;  %v2445_v55 = vld [vmem:[%s4036_s0 + $0x74] sm:$0xf] }
 0x439   :  { %v753_v58 = vadd.f32 %v2438_v54, %v751_v56  ;;  %v763_v63 = vsub.f32 1.0, %v759_v62  ;;  %v767_v31 = vmul.f32 %v759_v62, %v3471_v60 }
 0x43a   :  { %2989 = vtanh.f32 %v752_v57 }
 0x43b   :  { %2991 = vtanh.f32 %v753_v58 }
 0x444   :  { %v2990_v50 = vpop.eup %2989 }
 0x445   :  { %v2992_v26 = vpop.eup %2991  ;;  %v764_v27 = vmul.f32 %v2990_v50, %v762_v49 }
 0x446   :  { %v765_v30 = vmul.f32 %v2992_v26, %v763_v63 }
 0x447   :  { %v3527_v32 = vadd.f32 %v766_v28, %v764_v27 }
 0x448   :  { %v3529_v33 = vadd.f32 %v767_v31, %v765_v30 }
 0x44a   :  { %v2446_v34 = vpack.c.bf16 %v3529_v33, %v3527_v32 }
 0x44c   :  { %v786_v38 = vrot.slane %v2446_v34, %v3355_v37 }
 0x44e   :  { %821 = vmatmul.mubr.bf16.vlgmr.msra.gmra.mrb[16].mxu0 %v786_v38  ;;  %2757 = vmatmul.mubr.bf16.vlgmr.msra.gmra.mrb[16].mxu1 %v786_v38 }
 0x44f   :  { %933 = vmatpush1.bf16.msra.mxu0 %v3145_v3  ;;  %2761 = vmatpush3.bf16.msra.mxu1 %v3182_v9 }
 0x450   :  { %934 = vmatprep.subr.bf16.mxu0 %v3153_v4  ;;  %2762 = vmatprep.subr.bf16.mxu1 %v3070_v1 }
 0x451   :  { %964 = vmatprep.mubr.bf16.mxu0 %v3071_v2  ;;  %2776 = vmatprep.mubr.msk.bf16.mxu1 %vm3072_vm0, %v3070_v1 }
 0x453   :  { %935 = vmatpush1.bf16.msra.mxu0 %v3159_v5  ;;  %2763 = vmatpush3.bf16.msra.mxu1 %v3200_v12  ;;  %v2442_v5 = vld [vmem:[%s4036_s0 + $0x60] sm:$0xff] }
 0x454   :  { %936 = vmatprep.subr.bf16.mxu0 %v3165_v6  ;;  %2764 = vmatprep.subr.bf16.mxu1 %v3070_v1  ;;  %v2444_v6 = vld [vmem:[%s4036_s0 + $0x6c] sm:$0xff] }
 0x457   :  { %937 = vmatpush1.bf16.msra.mxu0 %v3171_v7  ;;  %2765 = vmatpush3.bf16.msra.mxu1 %v3219_v15 }
 0x458   :  { %938 = vmatprep.subr.bf16.mxu0 %v3177_v8  ;;  %2766 = vmatprep.subr.bf16.mxu1 %v3070_v1 }
 0x45b   :  { %939 = vmatpush1.bf16.msra.mxu0 %v3188_v10  ;;  %2767 = vmatpush3.bf16.msra.mxu1 %v3238_v18 }
 0x45c   :  { %940 = vmatprep.subr.bf16.mxu0 %v3193_v11  ;;  %2768 = vmatprep.subr.bf16.mxu1 %v3070_v1 }
 0x45f   :  { %941 = vmatpush1.bf16.msra.mxu0 %v3206_v13  ;;  %2769 = vmatpush3.bf16.msra.mxu1 %v3257_v21 }
 0x460   :  { %942 = vmatprep.subr.bf16.mxu0 %v3212_v14  ;;  %2770 = vmatprep.subr.bf16.mxu1 %v3070_v1 }
 0x463   :  { %943 = vmatpush1.bf16.msra.mxu0 %v3226_v16  ;;  %2771 = vmatpush3.bf16.msra.mxu1 %v3271_v23 }
 0x464   :  { %944 = vmatprep.subr.bf16.mxu0 %v3232_v17  ;;  %2772 = vmatprep.subr.bf16.mxu1 %v3070_v1 }
 0x467   :  { %945 = vmatpush1.bf16.msra.mxu0 %v3245_v19  ;;  %2773 = vmatpush3.bf16.msra.mxu1 %v3279_v24 }
 0x468   :  { %946 = vmatprep.subr.bf16.mxu0 %v3251_v20  ;;  %2774 = vmatprep.subr.bf16.mxu1 %v3070_v1 }
 0x46b   :  { %947 = vmatpush1.bf16.msra.mxu0 %v3264_v22  ;;  %2775 = vmatpush3.bf16.msra.mxu1 %v3290_v25 }
 0x46c   :  { %1076 = vmatprep.subr.bf16.mxu0 %v3138_v0  ;;  %2780 = vmatprep.subr.bf16.mxu1 %v3070_v1 }
 0x521   :  { %v822_v3 = vpop.f32.mrb[16].mxu0  ;;  %v863_v4 = vpop.f32.mrb[16].mxu1 }
 0x522   :  { %v824_v7 = vpop.f32.mrb[17].mxu0  ;;  %v2758_v8 = vpop.f32.mrb[17].mxu1  ;;  %v874_v51 = vcombine.high %v863_v4, %v863_v4  ;;  %v892_v52 = vadd.f32 %v3338_v47, %v863_v4 }
 0x523   :  { %v872_v10 = vcombine.low %v822_v3, %v824_v7  ;;  %v873_v11 = vcombine.high %v822_v3, %v824_v7  ;;  %v826_v59 = vpop.f32.mrb[18].mxu0  ;;  %v866_v60 = vpop.f32.mrb[18].mxu1  ;;  %v3626_v7 = vld [vmem:[%s4035_s1 + $0x30] ss:$12 sps:$4 sm:$0xff]   ;;  %v3640_v8 = vld [vmem:[%s4035_s1 + $0x48] ss:$12 sps:$4 sm:$0xff]  }
 0x524   :  { %v827_v39 = vpop.f32.mrb[19].mxu0  ;;  %v2759_v0 = vpop.f32.mrb[19].mxu1  ;;  %v893_v36 = vadd.f32 %v3338_v47, %v874_v51 }
 0x525   :  { %v878_v40 = vadd.f32 %v2442_v5, %v872_v10  ;;  %v879_v41 = vadd.f32 %v2444_v6, %v873_v11  ;;  %v3595_v6 = vld [vmem:[%s4035_s1] ss:$12 sps:$4 sm:$0xff]  }
 0x527   :  { %v2447_v42 = vmul.f32 -1.442695, %v878_v40  ;;  %v2448_v43 = vmul.f32 -1.442695, %v879_v41 }
 0x529   :  { %2993 = vpow2.f32 %v2447_v42 }
 0x52a   :  { %2995 = vpow2.f32 %v2448_v43 }
 0x533   :  { %v2994_v44 = vpop.eup %2993 }
 0x534   :  { %v2996_v45 = vpop.eup %2995  ;;  %v886_v46 = vadd.f32 1.0, %v2994_v44 }
 0x535   :  { %v887_v48 = vadd.f32 1.0, %v2996_v45 }
 0x536   :  { %2997 = vrcp.f32 %v886_v46 }
 0x537   :  { %2999 = vrcp.f32 %v887_v48  ;;  %v2450_v48 = vld [vmem:[%s4036_s0 + $0x80] sm:$0xf] }
 0x540   :  { %v2998_v35 = vpop.eup %2997 }
 0x541   :  { %v3000_v54 = vpop.eup %2999  ;;  %v894_v56 = vmul.f32 %v2998_v35, %v892_v52  ;;  %v902_v62 = vrot.slane %v2998_v35, 4  ;;  %v2452_v52 = vld [vmem:[%s4036_s0 + $0x8c] sm:$0xf] }
 0x542   :  { %v895_v57 = vmul.f32 %v3000_v54, %v893_v36  ;;  %v903_v49 = vrot.slane %v3000_v54, 4 }
 0x543   :  { %v896_v58 = vadd.f32 %v2443_v53, %v894_v56  ;;  %v906_v50 = vsub.f32 1.0, %v902_v62  ;;  %v910_v30 = vmul.f32 %v902_v62, %v3527_v32  ;;  %v3602_v32 = vld [vmem:[%s4035_s1 + $0x1c] ss:$12 sps:$4 sm:$0xff]  }
 0x544   :  { %v897_v61 = vadd.f32 %v2445_v55, %v895_v57  ;;  %v907_v26 = vsub.f32 1.0, %v903_v49  ;;  %v911_v34 = vmul.f32 %v903_v49, %v3529_v33  ;;  %v3612_v33 = vld [vmem:[%s4035_s1 + $0x18] ss:$12 sps:$4 sm:$0xff]  }
 0x545   :  { %3001 = vtanh.f32 %v896_v58 }
 0x546   :  { %3003 = vtanh.f32 %v897_v61 }
 0x54f   :  { %v3002_v63 = vpop.eup %3001 }
 0x550   :  { %v3004_v27 = vpop.eup %3003  ;;  %v908_v28 = vmul.f32 %v3002_v63, %v906_v50 }
 0x551   :  { %v909_v31 = vmul.f32 %v3004_v27, %v907_v26 }
 0x552   :  { %v3585_v38 = vadd.f32 %v910_v30, %v908_v28 }
 0x553   :  { %v3587_v3 = vadd.f32 %v911_v34, %v909_v31  ;;  %v3054_v31 = vld [vmem:[%s4035_s1 + $0x8] ss:$12 sps:$4 sm:$0xff]   ;;  %v3055_v34 = vld [vmem:[%s4035_s1 + $0x20] ss:$12 sps:$4 sm:$0xff]  }
 0x555   :  { %v2453_v4 = vpack.c.bf16 %v3587_v3, %v3585_v38 }
 0x557   :  { %v930_v5 = vrot.slane %v2453_v4, %v3355_v37  ;;  %v3059_v4 = vld [vmem:[%s4035_s1 + $0x68] ss:$12 sps:$4 sm:$0xff]  }
 0x559   :  { %965 = vmatmul.mubr.bf16.vlgmr.msra.gmra.mrb[20].mxu0 %v930_v5  ;;  %2777 = vmatmul.mubr.bf16.vlgmr.msra.gmra.mrb[20].mxu1 %v930_v5  ;;  %v3060_v5 = vld [vmem:[%s4035_s1 + $0x7c] ss:$12 sps:$4 sm:$0xff]  }
 0x55a   :  { %1077 = vmatpush1.bf16.msra.mxu0 %v3595_v6  ;;  %2781 = vmatpush3.bf16.msra.mxu1 %v3182_v9  ;;  %v3619_v9 = vld [vmem:[%s4035_s1 + $0x34] ss:$12 sps:$4 sm:$0xff]  }
 0x55b   :  { %1078 = vmatprep.subr.bf16.mxu0 %v3602_v32  ;;  %2782 = vmatprep.subr.bf16.mxu1 %v3070_v1 }
 0x55c   :  { %1108 = vmatprep.mubr.bf16.mxu0 %v3071_v2  ;;  %2796 = vmatprep.mubr.msk.bf16.mxu1 %vm3072_vm0, %v3070_v1 }
 0x55e   :  { %1079 = vmatpush1.bf16.msra.mxu0 %v3612_v33  ;;  %2783 = vmatpush3.bf16.msra.mxu1 %v3200_v12  ;;  %v3633_v12 = vld [vmem:[%s4035_s1 + $0x4c] ss:$12 sps:$4 sm:$0xff]  }
 0x55f   :  { %1080 = vmatprep.subr.bf16.mxu0 %v3619_v9  ;;  %2784 = vmatprep.subr.bf16.mxu1 %v3070_v1 }
 0x562   :  { %1081 = vmatpush1.bf16.msra.mxu0 %v3626_v7  ;;  %2785 = vmatpush3.bf16.msra.mxu1 %v3219_v15  ;;  %v3647_v15 = vld [vmem:[%s4035_s1 + $0x64] ss:$12 sps:$4 sm:$0xff]  }
 0x563   :  { %1082 = vmatprep.subr.bf16.mxu0 %v3633_v12  ;;  %2786 = vmatprep.subr.bf16.mxu1 %v3070_v1 }
 0x566   :  { %1083 = vmatpush1.bf16.msra.mxu0 %v3640_v8  ;;  %2787 = vmatpush3.bf16.msra.mxu1 %v3238_v18  ;;  %v2451_v18 = vld [vmem:[%s4036_s0 + $0x84] sm:$0xff] }
 0x567   :  { %1084 = vmatprep.subr.bf16.mxu0 %v3647_v15  ;;  %2788 = vmatprep.subr.bf16.mxu1 %v3070_v1 }
 0x56a   :  { %1085 = vmatpush1.bf16.msra.mxu0 %v3206_v13  ;;  %2789 = vmatpush3.bf16.msra.mxu1 %v3257_v21  ;;  %v3053_v13 = vld [vmem:[%s4035_s1 + $0x4] ss:$12 sps:$4 sm:$0xff]  }
 0x56b   :  { %1086 = vmatprep.subr.bf16.mxu0 %v3212_v14  ;;  %2790 = vmatprep.subr.bf16.mxu1 %v3070_v1 }
 0x56e   :  { %1087 = vmatpush1.bf16.msra.mxu0 %v3226_v16  ;;  %2791 = vmatpush3.bf16.msra.mxu1 %v3271_v23 }
 0x56f   :  { %1088 = vmatprep.subr.bf16.mxu0 %v3232_v17  ;;  %2792 = vmatprep.subr.bf16.mxu1 %v3070_v1  ;;  %v2449_v17 = vld [vmem:[%s4036_s0 + $0x78] sm:$0xff] }
 0x572   :  { %1089 = vmatpush1.bf16.msra.mxu0 %v3245_v19  ;;  %2793 = vmatpush3.bf16.msra.mxu1 %v3279_v24 }
 0x573   :  { %1090 = vmatprep.subr.bf16.mxu0 %v3251_v20  ;;  %2794 = vmatprep.subr.bf16.mxu1 %v3070_v1 }
 0x576   :  { %1091 = vmatpush1.bf16.msra.mxu0 %v3264_v22  ;;  %2795 = vmatpush3.bf16.msra.mxu1 %v3290_v25 }
 0x577   :  { %1220 = vmatprep.subr.bf16.mxu0 %v3053_v13  ;;  %2800 = vmatprep.subr.bf16.mxu1 %v3070_v1 }
 0x62c   :  { %v966_v14 = vpop.f32.mrb[20].mxu0  ;;  %v1007_v16 = vpop.f32.mrb[20].mxu1 }
 0x62d   :  { %v968_v19 = vpop.f32.mrb[21].mxu0  ;;  %v2778_v20 = vpop.f32.mrb[21].mxu1  ;;  %v1018_v43 = vcombine.high %v1007_v16, %v1007_v16  ;;  %v1036_v44 = vadd.f32 %v3338_v47, %v1007_v16  ;;  %v2456_v16 = vld [vmem:[%s4036_s0 + $0x90] sm:$0xff] }
 0x62e   :  { %v1016_v21 = vcombine.low %v966_v14, %v968_v19  ;;  %v1017_v22 = vcombine.high %v966_v14, %v968_v19  ;;  %v970_v23 = vpop.f32.mrb[22].mxu0  ;;  %v1010_v24 = vpop.f32.mrb[22].mxu1 }
 0x62f   :  { %v971_v25 = vpop.f32.mrb[23].mxu0  ;;  %v2779_v10 = vpop.f32.mrb[23].mxu1  ;;  %v1037_v46 = vadd.f32 %v3338_v47, %v1018_v43  ;;  %v3765_v43 = vld [vmem:[%s4037_s2] ss:$0 sm:$0xff] }
 0x630   :  { %v1022_v11 = vadd.f32 %v2449_v17, %v1016_v21  ;;  %v1023_v59 = vadd.f32 %v2451_v18, %v1017_v22  ;;  %v2458_v17 = vld [vmem:[%s4036_s0 + $0x9c] sm:$0xff] }
 0x632   :  { %v2454_v60 = vmul.f32 -1.442695, %v1022_v11  ;;  %v2455_v39 = vmul.f32 -1.442695, %v1023_v59 }
 0x634   :  { %3005 = vpow2.f32 %v2454_v60 }
 0x635   :  { %3007 = vpow2.f32 %v2455_v39 }
 0x63e   :  { %v3006_v0 = vpop.eup %3005 }
 0x63f   :  { %v3008_v40 = vpop.eup %3007  ;;  %v1030_v41 = vadd.f32 1.0, %v3006_v0 }
 0x640   :  { %v1031_v42 = vadd.f32 1.0, %v3008_v40 }
 0x641   :  { %3009 = vrcp.f32 %v1030_v41 }
 0x642   :  { %3011 = vrcp.f32 %v1031_v42 }
 0x64b   :  { %v3010_v45 = vpop.eup %3009 }
 0x64c   :  { %v3012_v51 = vpop.eup %3011  ;;  %v1038_v35 = vmul.f32 %v3010_v45, %v1036_v44  ;;  %v1046_v55 = vrot.slane %v3010_v45, 4 }
 0x64d   :  { %v1039_v36 = vmul.f32 %v3012_v51, %v1037_v46  ;;  %v1047_v56 = vrot.slane %v3012_v51, 4 }
 0x64e   :  { %v1040_v53 = vadd.f32 %v2450_v48, %v1038_v35  ;;  %v1050_v57 = vsub.f32 1.0, %v1046_v55  ;;  %v1054_v49 = vmul.f32 %v1046_v55, %v3585_v38  ;;  %v3057_v38 = vld [vmem:[%s4035_s1 + $0x50] ss:$12 sps:$4 sm:$0xff]   ;;  %v2457_v48 = vld [vmem:[%s4036_s0 + $0x98] sm:$0xf] }
 0x64f   :  { %v1041_v54 = vadd.f32 %v2452_v52, %v1039_v36  ;;  %v1051_v47 = vsub.f32 1.0, %v1047_v56  ;;  %v1055_v63 = vmul.f32 %v1047_v56, %v3587_v3  ;;  %v3058_v3 = vld [vmem:[%s4035_s1 + $0x60] ss:$12 sps:$4 sm:$0xff]   ;;  %v2459_v52 = vld [vmem:[%s4036_s0 + $0xa4] sm:$0xf] }
 0x650   :  { %3013 = vtanh.f32 %v1040_v53 }
 0x651   :  { %3015 = vtanh.f32 %v1041_v54 }
 0x65a   :  { %v3014_v58 = vpop.eup %3013 }
 0x65b   :  { %v3016_v61 = vpop.eup %3015  ;;  %v1052_v62 = vmul.f32 %v3014_v58, %v1050_v57 }
 0x65c   :  { %v1053_v50 = vmul.f32 %v3016_v61, %v1051_v47 }
 0x65d   :  { %v3685_v26 = vadd.f32 %v1054_v49, %v1052_v62 }
 0x65e   :  { %v3687_v27 = vadd.f32 %v1055_v63, %v1053_v50 }
 0x660   :  { %v2460_v28 = vpack.c.bf16 %v3687_v27, %v3685_v26 }
 0x662   :  { %v1074_v30 = vrot.slane %v2460_v28, %v3355_v37 }
 0x664   :  { %1109 = vmatmul.mubr.bf16.vlgmr.msra.gmra.mrb[24].mxu0 %v1074_v30  ;;  %2797 = vmatmul.mubr.bf16.vlgmr.msra.gmra.mrb[24].mxu1 %v1074_v30 }
 0x665   :  { %1221 = vmatpush1.bf16.msra.mxu0 %v3595_v6  ;;  %2801 = vmatpush3.bf16.msra.mxu1 %v3054_v31  ;;  %v3061_v6 = vld [vmem:[%s4035_s1 + $0x78] ss:$12 sps:$4 sm:$0xff]  }
 0x666   :  { %1222 = vmatprep.subr.bf16.mxu0 %v3602_v32  ;;  %2802 = vmatprep.subr.bf16.mxu1 %v3070_v1  ;;  %v3062_v32 = vld [vmem:[%s4035_s1 + $0x80] ss:$12 sps:$4 sm:$0xff]  }
 0x667   :  { %1252 = vmatprep.mubr.bf16.mxu0 %v3071_v2  ;;  %2816 = vmatprep.mubr.msk.bf16.mxu1 %vm3072_vm0, %v3070_v1  ;;  %v3056_v2 = vld [vmem:[%s4035_s1 + $0x38] ss:$12 sps:$4 sm:$0xff]  }
 0x669   :  { %1223 = vmatpush1.bf16.msra.mxu0 %v3612_v33  ;;  %2803 = vmatpush3.bf16.msra.mxu1 %v3055_v34  ;;  %v3063_v33 = vld [vmem:[%s4035_s1 + $0x94] ss:$12 sps:$4 sm:$0xff]  }
 0x66a   :  { %1224 = vmatprep.subr.bf16.mxu0 %v3619_v9  ;;  %2804 = vmatprep.subr.bf16.mxu1 %v3070_v1  ;;  %v3064_v9 = vld [vmem:[%s4035_s1 + $0x90] ss:$12 sps:$4 sm:$0xff]  }
 0x66d   :  { %1225 = vmatpush1.bf16.msra.mxu0 %v3626_v7  ;;  %2805 = vmatpush3.bf16.msra.mxu1 %v3056_v2  ;;  %v3065_v7 = vld [vmem:[%s4035_s1 + $0x98] ss:$12 sps:$4 sm:$0xff]   ;;  %v2899_v2 = vld [vmem:[%s4038_s3 + $0x10] sm:$0xff]  }
 0x66e   :  { %1226 = vmatprep.subr.bf16.mxu0 %v3633_v12  ;;  %2806 = vmatprep.subr.bf16.mxu1 %v3070_v1  ;;  %v3066_v12 = vld [vmem:[%s4035_s1 + $0xac] ss:$12 sps:$4 sm:$0xff]  }
 0x671   :  { %1227 = vmatpush1.bf16.msra.mxu0 %v3640_v8  ;;  %2807 = vmatpush3.bf16.msra.mxu1 %v3057_v38  ;;  %v3067_v8 = vld [vmem:[%s4035_s1 + $0xa8] ss:$12 sps:$4 sm:$0xff]   ;;  %v2900_v38 = vld [vmem:[%s4038_s3 + $0x18] sm:$0xff]  }
 0x672   :  { %1228 = vmatprep.subr.bf16.mxu0 %v3647_v15  ;;  %2808 = vmatprep.subr.bf16.mxu1 %v3070_v1  ;;  %v3068_v15 = vld [vmem:[%s4035_s1 + $0xb0] ss:$12 sps:$4 sm:$0xff]  }
 0x675   :  { %1229 = vmatpush1.bf16.msra.mxu0 %v3058_v3  ;;  %2809 = vmatpush3.bf16.msra.mxu1 %v3059_v4  ;;  %v2901_v3 = vld [vmem:[%s4038_s3 + $0x20] sm:$0xff]   ;;  %v2902_v4 = vld [vmem:[%s4038_s3 + $0x28] sm:$0xff]  }
 0x676   :  { %1230 = vmatprep.subr.bf16.mxu0 %v3060_v5  ;;  %2810 = vmatprep.subr.bf16.mxu1 %v3070_v1  ;;  %v2903_v5 = vld [vmem:[%s4039_s5 + $0x40] sm:$0xff]  }
 0x679   :  { %1231 = vmatpush1.bf16.msra.mxu0 %v3061_v6  ;;  %2811 = vmatpush3.bf16.msra.mxu1 %v3062_v32  ;;  %v2904_v6 = vld [vmem:[%s4039_s5] sm:$0xff]   ;;  %v2906_v32 = vld [vmem:[%s4039_s5 + $0x48] sm:$0xff]  }
 0x67a   :  { %1232 = vmatprep.subr.bf16.mxu0 %v3063_v33  ;;  %2812 = vmatprep.subr.bf16.mxu1 %v3070_v1  ;;  %v2907_v33 = vld [vmem:[%s4039_s5 + $0x8] sm:$0xff]  }
 0x67d   :  { %1233 = vmatpush1.bf16.msra.mxu0 %v3064_v9  ;;  %2813 = vmatpush3.bf16.msra.mxu1 %v3065_v7  ;;  %v2909_v9 = vld [vmem:[%s4039_s5 + $0x50] sm:$0xff]  }
 0x67e   :  { %1234 = vmatprep.subr.bf16.mxu0 %v3066_v12  ;;  %2814 = vmatprep.subr.bf16.mxu1 %v3070_v1  ;;  %v2905_v7 = vld [vmem:[%s4038_s3 + $0x30] sm:$0xff]  }
 0x67f   :  { %v2910_v12 = vld [vmem:[%s4039_s5 + $0x10] sm:$0xff]  }
 0x681   :  { %1235 = vmatpush1.bf16.msra.mxu0 %v3067_v8  ;;  %2815 = vmatpush3.bf16.msra.mxu1 %v3068_v15  ;;  %v2908_v8 = vld [vmem:[%s4038_s3 + $0x38] sm:$0xff]   ;;  %v2911_v15 = vld [vmem:[%s4040_s7 + $0x40] sm:$0xff]  }
 0x682   :  { %2820 = vmatprep.subr.bf16.mxu0 %v3070_v1  ;;  %2607 = vmatprep.subr.bf16.mxu1 %v2903_v5 }
 0x737   :  { %v1110_v13 = vpop.f32.mrb[24].mxu0  ;;  %v1151_v14 = vpop.f32.mrb[24].mxu1 }
 0x738   :  { %v1112_v18 = vpop.f32.mrb[25].mxu0  ;;  %v2798_v19 = vpop.f32.mrb[25].mxu1  ;;  %v1162_v42 = vcombine.high %v1151_v14, %v1151_v14  ;;  %v1180_v44 = vadd.f32 %v3765_v43, %v1151_v14  ;;  %v2914_v14 = vld [vmem:[%s4039_s5 + $0x18] sm:$0xff]  }
 0x739   :  { %v1160_v20 = vcombine.low %v1110_v13, %v1112_v18  ;;  %v1161_v21 = vcombine.high %v1110_v13, %v1112_v18  ;;  %v1114_v22 = vpop.f32.mrb[26].mxu0  ;;  %v1154_v23 = vpop.f32.mrb[26].mxu1  ;;  %v2913_v13 = vld [vmem:[%s4039_s5 + $0x58] sm:$0xff]   ;;  %v2921_v18 = vld [vmem:[%s4039_s5 + $0x68] sm:$0xff]  }
 0x73a   :  { %v1115_v24 = vpop.f32.mrb[27].mxu0  ;;  %v2799_v25 = vpop.f32.mrb[27].mxu1  ;;  %v1181_v46 = vadd.f32 %v3765_v43, %v1162_v42  ;;  %v2922_v19 = vld [vmem:[%s4039_s5 + $0x28] sm:$0xff]   ;;  %v2929_v22 = vld [vmem:[%s4039_s5 + $0x78] sm:$0xff]  }
 0x73b   :  { %v1166_v10 = vadd.f32 %v2456_v16, %v1160_v20  ;;  %v1167_v11 = vadd.f32 %v2458_v17, %v1161_v21  ;;  %v2917_v16 = vld [vmem:[%s4039_s5 + $0x60] sm:$0xff]   ;;  %v2925_v20 = vld [vmem:[%s4039_s5 + $0x70] sm:$0xff]   ;;  %v2930_v23 = vld [vmem:[%s4039_s5 + $0x38] sm:$0xff]  }
 0x73c   :  { %v2918_v17 = vld [vmem:[%s4039_s5 + $0x20] sm:$0xff]   ;;  %v2926_v21 = vld [vmem:[%s4039_s5 + $0x30] sm:$0xff]  }
 0x73d   :  { %v2461_v59 = vmul.f32 -1.442695, %v1166_v10  ;;  %v2462_v60 = vmul.f32 -1.442695, %v1167_v11  ;;  %v2463_v10 = vld [vmem:[%s4036_s0 + $0xa8] sm:$0xff]  ;;  %v2465_v11 = vld [vmem:[%s4036_s0 + $0xb4] sm:$0xff] }
 0x73f   :  { %3017 = vpow2.f32 %v2461_v59 }
 0x740   :  { %3019 = vpow2.f32 %v2462_v60 }
 0x749   :  { %v3018_v39 = vpop.eup %3017 }
 0x74a   :  { %v3020_v0 = vpop.eup %3019  ;;  %v1174_v40 = vadd.f32 1.0, %v3018_v39 }
 0x74b   :  { %v1175_v41 = vadd.f32 1.0, %v3020_v0 }
 0x74c   :  { %3021 = vrcp.f32 %v1174_v40 }
 0x74d   :  { %3023 = vrcp.f32 %v1175_v41 }
 0x756   :  { %v3022_v45 = vpop.eup %3021 }
 0x757   :  { %v3024_v51 = vpop.eup %3023  ;;  %v1182_v35 = vmul.f32 %v3022_v45, %v1180_v44  ;;  %v1190_v55 = vrot.slane %v3022_v45, 4 }
 0x758   :  { %v1183_v36 = vmul.f32 %v3024_v51, %v1181_v46  ;;  %v1191_v56 = vrot.slane %v3024_v51, 4 }
 0x759   :  { %v1184_v53 = vadd.f32 %v2457_v48, %v1182_v35  ;;  %v1194_v57 = vsub.f32 1.0, %v1190_v55  ;;  %v1198_v49 = vmul.f32 %v1190_v55, %v3685_v26  ;;  %v2897_v26 = vld [vmem:[%s4038_s3] sm:$0xff]  }
 0x75a   :  { %v1185_v54 = vadd.f32 %v2459_v52, %v1183_v36  ;;  %v1195_v47 = vsub.f32 1.0, %v1191_v56  ;;  %v1199_v63 = vmul.f32 %v1191_v56, %v3687_v27  ;;  %v2898_v27 = vld [vmem:[%s4038_s3 + $0x8] sm:$0xff]  }
 0x75b   :  { %3025 = vtanh.f32 %v1184_v53 }
 0x75c   :  { %3027 = vtanh.f32 %v1185_v54 }
 0x765   :  { %v3026_v58 = vpop.eup %3025 }
 0x766   :  { %v3028_v61 = vpop.eup %3027  ;;  %v1196_v62 = vmul.f32 %v3026_v58, %v1194_v57  ;;  %v2464_v58 = vld [vmem:[%s4036_s0 + $0xb0] sm:$0xf] }
 0x767   :  { %v1197_v50 = vmul.f32 %v3028_v61, %v1195_v47  ;;  %v2466_v61 = vld [vmem:[%s4036_s0 + $0xbc] sm:$0xf] }
 0x768   :  { %v3777_v28 = vadd.f32 %v1198_v49, %v1196_v62 }
 0x769   :  { %v3779_v30 = vadd.f32 %v1199_v63, %v1197_v50 }
 0x76b   :  { %v2467_v31 = vpack.c.bf16 %v3779_v30, %v3777_v28 }
 0x76d   :  { %v1218_v34 = vrot.slane %v2467_v31, %v3355_v37 }
 0x76f   :  { %1253 = vmatmul.mubr.bf16.vlgmr.msra.gmra.mrb[28].mxu0 %v1218_v34  ;;  %2817 = vmatmul.mubr.bf16.vlgmr.msra.gmra.mrb[28].mxu1 %v1218_v34 }
 0x770   :  { %2836 = vmatprep.mubr.msk.bf16.mxu0 %vm3072_vm0, %v3070_v1  ;;  %2821 = vmatpush3.bf16.msra.mxu0 %v2897_v26 }
 0x771   :  { %2822 = vmatprep.subr.bf16.mxu0 %v3070_v1  ;;  %2608 = vmatpush3.bf16.msra.mxu1 %v2904_v6  ;;  %v3074_v6 = vmov 1966171168  }
 0x772   :  { %2609 = vmatprep.subr.bf16.mxu1 %v2906_v32  ;;  %v1545_v32 = vunpack.c.l.s4 %v3074_v6 }
 0x774   :  { %2823 = vmatpush3.bf16.msra.mxu0 %v2898_v27 }
 0x775   :  { %2824 = vmatprep.subr.bf16.mxu0 %v3070_v1  ;;  %2610 = vmatpush3.bf16.msra.mxu1 %v2907_v33 }
 0x776   :  { %2611 = vmatprep.subr.bf16.mxu1 %v2909_v9 }
 0x778   :  { %2825 = vmatpush3.bf16.msra.mxu0 %v2899_v2 }
 0x779   :  { %2826 = vmatprep.subr.bf16.mxu0 %v3070_v1  ;;  %2612 = vmatpush3.bf16.msra.mxu1 %v2910_v12 }
 0x77a   :  { %2613 = vmatprep.subr.bf16.mxu1 %v2913_v13 }
 0x77c   :  { %2827 = vmatpush3.bf16.msra.mxu0 %v2900_v38 }
 0x77d   :  { %2828 = vmatprep.subr.bf16.mxu0 %v3070_v1  ;;  %2614 = vmatpush3.bf16.msra.mxu1 %v2914_v14  ;;  %v2912_v14 = vld [vmem:[%s4040_s7] sm:$0xff]  }
 0x77e   :  { %2615 = vmatprep.subr.bf16.mxu1 %v2917_v16 }
 0x780   :  { %2829 = vmatpush3.bf16.msra.mxu0 %v2901_v3 }
 0x781   :  { %2830 = vmatprep.subr.bf16.mxu0 %v3070_v1  ;;  %2616 = vmatpush3.bf16.msra.mxu1 %v2918_v17 }
 0x782   :  { %2617 = vmatprep.subr.bf16.mxu1 %v2921_v18 }
 0x784   :  { %2831 = vmatpush3.bf16.msra.mxu0 %v2902_v4 }
 0x785   :  { %2832 = vmatprep.subr.bf16.mxu0 %v3070_v1  ;;  %2618 = vmatpush3.bf16.msra.mxu1 %v2922_v19 }
 0x786   :  { %2619 = vmatprep.subr.bf16.mxu1 %v2925_v20 }
 0x788   :  { %2833 = vmatpush3.bf16.msra.mxu0 %v2905_v7 }
 0x789   :  { %2834 = vmatprep.subr.bf16.mxu0 %v3070_v1  ;;  %2620 = vmatpush3.bf16.msra.mxu1 %v2926_v21 }
 0x78a   :  { %2621 = vmatprep.subr.bf16.mxu1 %v2929_v22  ;;  %v2916_v22 = vld [vmem:[%s4040_s7 + $0x8] sm:$0xff]  }
 0x78c   :  { %2835 = vmatpush3.bf16.msra.mxu0 %v2908_v8 }
 0x78d   :  { %2629 = vmatprep.subr.bf16.mxu0 %v2911_v15  ;;  %2622 = vmatpush3.bf16.msra.mxu1 %v2930_v23  ;;  %v1546_v15 = vunpack.c.0.s8 %v1545_v32  ;;  %v2934_v32 = vld [vmem:[%s4040_s7 + $0x80] sm:$0xff]  }
 0x78e   :  { %2840 = vmatprep.subr.bf16.mxu1 %v3070_v1 }
 0x78f   :  { %v3893_v21 = vsub.s32 %v1546_v15, %v3348_v29 }
 0x842   :  { %v1254_v24 = vpop.f32.mrb[28].mxu0  ;;  %v1295_v25 = vpop.f32.mrb[28].mxu1 }
 0x843   :  { %v1256_v59 = vpop.f32.mrb[29].mxu0  ;;  %v2818_v60 = vpop.f32.mrb[29].mxu1  ;;  %v1306_v54 = vcombine.high %v1295_v25, %v1295_v25  ;;  %v1324_v55 = vadd.f32 %v3765_v43, %v1295_v25  ;;  %v2919_v25 = vld [vmem:[%s4040_s7 + $0x50] sm:$0xff]  }
 0x844   :  { %v1304_v39 = vcombine.low %v1254_v24, %v1256_v59  ;;  %v1305_v0 = vcombine.high %v1254_v24, %v1256_v59  ;;  %v1258_v40 = vpop.f32.mrb[30].mxu0  ;;  %v1298_v41 = vpop.f32.mrb[30].mxu1 }
 0x845   :  { %v1259_v42 = vpop.f32.mrb[31].mxu0  ;;  %v2819_v44 = vpop.f32.mrb[31].mxu1  ;;  %v1325_v57 = vadd.f32 %v3765_v43, %v1306_v54  ;;  %v2923_v41 = vld [vmem:[%s4040_s7 + $0x58] sm:$0xff]   ;;  %v2927_v54 = vld [vmem:[%s4040_s7 + $0x60] sm:$0xff]  }
 0x846   :  { %v1310_v45 = vadd.f32 %v2463_v10, %v1304_v39  ;;  %v1311_v46 = vadd.f32 %v2465_v11, %v1305_v0  ;;  %v2920_v39 = vld [vmem:[%s4040_s7 + $0x10] sm:$0xff]  }
 0x848   :  { %v2468_v48 = vmul.f32 -1.442695, %v1310_v45  ;;  %v2469_v51 = vmul.f32 -1.442695, %v1311_v46 }
 0x84a   :  { %3029 = vpow2.f32 %v2468_v48 }
 0x84b   :  { %3031 = vpow2.f32 %v2469_v51 }
 0x854   :  { %v3030_v52 = vpop.eup %3029 }
 0x855   :  { %v3032_v35 = vpop.eup %3031  ;;  %v1318_v36 = vadd.f32 1.0, %v3030_v52 }
 0x856   :  { %v1319_v53 = vadd.f32 1.0, %v3032_v35  ;;  %v2924_v35 = vld [vmem:[%s4040_s7 + $0x18] sm:$0xff]  }
 0x857   :  { %3033 = vrcp.f32 %v1318_v36 }
 0x858   :  { %3035 = vrcp.f32 %v1319_v53 }
 0x861   :  { %v3034_v56 = vpop.eup %3033 }
 0x862   :  { %v3036_v47 = vpop.eup %3035  ;;  %v1326_v62 = vmul.f32 %v3034_v56, %v1324_v55  ;;  %v1334_v31 = vrot.slane %v3034_v56, 4 }
 0x863   :  { %v1327_v49 = vmul.f32 %v3036_v47, %v1325_v57  ;;  %v1335_v34 = vrot.slane %v3036_v47, 4 }
 0x864   :  { %v1328_v50 = vadd.f32 %v2464_v58, %v1326_v62  ;;  %v1338_v26 = vsub.f32 1.0, %v1334_v31  ;;  %v1342_v3 = vmul.f32 %v1334_v31, %v3777_v28  ;;  %v2915_v28 = vld [vmem:[%s4040_s7 + $0x48] sm:$0xff]  }
 0x865   :  { %v1329_v63 = vadd.f32 %v2466_v61, %v1327_v49  ;;  %v1339_v43 = vsub.f32 1.0, %v1335_v34  ;;  %v1343_v5 = vmul.f32 %v1335_v34, %v3779_v30  ;;  %v2928_v49 = vld [vmem:[%s4040_s7 + $0x20] sm:$0xff]  }
 0x866   :  { %3037 = vtanh.f32 %v1328_v50 }
 0x867   :  { %3039 = vtanh.f32 %v1329_v63  ;;  %v2931_v63 = vld [vmem:[%s4040_s7 + $0x68] sm:$0xff]  }
 0x870   :  { %v3038_v27 = vpop.eup %3037 }
 0x871   :  { %v3040_v2 = vpop.eup %3039  ;;  %v1340_v38 = vmul.f32 %v3038_v27, %v1338_v26 }
 0x872   :  { %v1341_v4 = vmul.f32 %v3040_v2, %v1339_v43  ;;  %v2932_v43 = vld [vmem:[%s4040_s7 + $0x28] sm:$0xff]  }
 0x873   :  { %v1344_v33 = vadd.f32 %v1342_v3, %v1340_v38 }
 0x874   :  { %v1345_v9 = vadd.f32 %v1343_v5, %v1341_v4  ;;  %v2933_v4 = vld [vmem:[%s4040_s7 + $0x70] sm:$0xff]  }
 0x875   :  { %v1346_v7 = vpack.c.bf16 %v1344_v33, %v1344_v33 }
 0x876   :  { %v1347_v12 = vpack.c.bf16 %v1345_v9, %v1345_v9  ;;  %v2471_v8 = vpack.c.bf16 %v1345_v9, %v1344_v33  ;;  %v2935_v33 = vld [vmem:[%s4040_s7 + $0x30] sm:$0xff]   ;;  %v2936_v9 = vld [vmem:[%s4040_s7 + $0x78] sm:$0xff]  }
 0x877   :  { %v1494_v13 = vshll.u32 %v1346_v7, 16  ;;  %v1492_v30 = vshrl.u32 %v1346_v7, 16  ;;  %v1960_v24 = vrot.slane %v1346_v7, 1 }
 0x878   :  { %v1379_v16 = vrot.slane %v2471_v8, %v3355_v37  ;;  %v1501_v17 = vshll.u32 %v1347_v12, 16  ;;  %v1499_v19 = vshrl.u32 %v1347_v12, 16  ;;  %v1961_v11 = vrot.slane %v1347_v12, 1  ;;  %v2939_v8 = vld [vmem:[%s4040_s7 + $0x90] sm:$0xff]  }
 0x879   :  { %v1496_v18 = vrot.slane %v1494_v13, 1  ;;  %v2022_v40 = vrot.slane %v1960_v24, %v3893_v21  ;;  %v2940_v13 = vld [vmem:[%s4040_s7 + $0x98] sm:$0xff]  }
 0x87a   :  { %2837 = vmatmul.mubr.bf16.vlgmr.msra.gmra.mrb[32].mxu0 %v1379_v16  ;;  %v1503_v20 = vrot.slane %v1501_v17, 1  ;;  %v2037_v44 = vrot.slane %v1961_v11, %v3893_v21  ;;  %v2942_v16 = vld [vmem:[%s4040_s7 + $0xa8] sm:$0xff]   ;;  %v2943_v17 = vld [vmem:[%s4040_s7 + $0xb0] sm:$0xff]  }
 0x87b   :  { %2630 = vmatpush3.bf16.msra.mxu0 %v2912_v14  ;;  %v1497_v23 = vor.u32 %v1496_v18, %v1492_v30  ;;  %v2941_v14 = vld [vmem:[%s4040_s7 + $0xa0] sm:$0xff]   ;;  %v16_v18 = vstv %s4041_s10 }
 0x87c   :  { %2631 = vmatprep.subr.bf16.mxu0 %v2915_v28  ;;  %v1504_v10 = vor.u32 %v1503_v20, %v1499_v19  ;;  %v2944_v28 = vld [vmem:[%s4040_s7 + $0xb8] sm:$0xff]   ;;  %17 = vst [vmem:[#allocation2] sm:$0x1] %v16_v18  ;;  %v2480_v19 = vld [vmem:[%s4042_s6] ss:$0 sm:$0xff] }
 0x87d   :  { %v1543_v59 = vcombine.low %v1346_v7, %v1497_v23  ;;  %v2937_v7 = vld [vmem:[%s4040_s7 + $0x88] sm:$0xff]   ;;  %v1601_v20 = vrot.slane %v2480_v19, %v3893_v21 }
 0x87e   :  { %v1566_v60 = vcombine.low %v1347_v12, %v1504_v10  ;;  %v2938_v12 = vld [vmem:[%s4040_s7 + $0x38] sm:$0xff]  }
 0x87f   :  { %2632 = vmatpush3.bf16.msra.mxu0 %v2916_v22  ;;  %v1550_v0 = vrot.slane %v1543_v59, %v3893_v21  ;;  %v1602_v22 = vcombine.high %v1601_v20, %v1601_v20  ;;  %v1609_v23 = vrot.slane %v1601_v20, %v3893_v21 }
 0x880   :  { %2633 = vmatprep.subr.bf16.mxu0 %v2919_v25  ;;  %v1573_v42 = vrot.slane %v1566_v60, %v3893_v21 }
 0x881   :  { %v2023_v45 = vcombine.low %v1550_v0, %v2022_v40  ;;  %v1551_v46 = vcombine.high %v1550_v0, %v1550_v0  ;;  %v1558_v58 = vrot.slane %v1550_v0, %v3893_v21  ;;  %v1616_v10 = vrot.slane %v1602_v22, %v3893_v21  ;;  %v2470_v0 = vld [vmem:[%s4043_s4] ss:$0 sm:$0xff] }
 0x882   :  { %v2038_v48 = vcombine.low %v1573_v42, %v2037_v44  ;;  %v1574_v51 = vcombine.high %v1573_v42, %v1573_v42  ;;  %v1581_v52 = vrot.slane %v1573_v42, %v3893_v21  ;;  %v1617_v11 = vcombine.high %v1609_v23, %v1609_v23 }
 0x883   :  { %2634 = vmatpush3.bf16.msra.mxu0 %v2920_v39  ;;  %v2030_v36 = vrot.slane %v2023_v45, %v3893_v21  ;;  %v1565_v53 = vrot.slane %v1551_v46, %v3893_v21  ;;  %v1750_v60 = vcombine.low %v1609_v23, %v1616_v10  ;;  %v1429_v44 = vcombine.low %v2470_v0, %v2470_v0 }
 0x884   :  { %2635 = vmatprep.subr.bf16.mxu0 %v2923_v41  ;;  %v2045_v55 = vrot.slane %v2038_v48, %v3893_v21  ;;  %v1588_v56 = vrot.slane %v1574_v51, %v3893_v21  ;;  %v1593_v57 = vunpack.i.h.s16 %v1581_v52  ;;  %v1751_v39 = vcombine.low %v1617_v11, %v1609_v23 }
 0x885   :  { %v2481_v47 = vpack.i.b16 %v1581_v52, %v1565_v53  ;;  %v1752_v40 = vcombine.low %v1616_v10, %v1617_v11  ;;  %v1759_v41 = vrot.slane %v1750_v60, %v3893_v21  ;;  %v2499_v60 = vld [vmem:[%s4044_s8] ss:$0 sm:$0xff] }
 0x886   :  { %v2046_v61 = vcombine.low %v2030_v36, %v2045_v55  ;;  %v2482_v62 = vpack.i.b16 %v1588_v56, %v1593_v57  ;;  %v1766_v42 = vrot.slane %v1751_v39, %v3893_v21 }
 0x887   :  { %2636 = vmatpush3.bf16.msra.mxu0 %v2924_v35  ;;  %v1621_v50 = vcombine.low %v1558_v58, %v2481_v47  ;;  %v1773_v45 = vrot.slane %v1752_v40, %v3893_v21 }
 0x888   :  { %2637 = vmatprep.subr.bf16.mxu0 %v2927_v54  ;;  %v2053_v31 = vrot.slane %v2046_v61, %v3893_v21  ;;  %v1635_v26 = vrot.slane %v2482_v62, %v3893_v21  ;;  %v1774_v46 = vcombine.low %v1759_v41, %v1766_v42  ;;  %v2217_v42 = vcombine.low %v2499_v60, %v2499_v60 }
 0x889   :  { %v1628_v34 = vrot.slane %v1621_v50, %v3893_v21  ;;  %v1788_v52 = vrot.slane %v1773_v45, %v3893_v21 }
 0x88a   :  { %v2054_v27 = vcombine.high %v2053_v31, %v2053_v31  ;;  %v2061_v15 = vrot.slane %v2053_v31, %v3893_v21  ;;  %v1781_v51 = vrot.slane %v1774_v46, %v3893_v21 }
 0x88b   :  { %2638 = vmatpush3.bf16.msra.mxu0 %v2928_v49  ;;  %v1637_v2 = vcombine.high %v1628_v34, %v1635_v26  ;;  %v1636_v38 = vcombine.low %v1628_v34, %v1635_v26 }
 0x88c   :  { %2639 = vmatprep.subr.bf16.mxu0 %v2931_v63  ;;  %v2068_v3 = vrot.slane %v2054_v27, %v3893_v21  ;;  %v2069_v30 = vcombine.high %v2061_v15, %v2061_v15  ;;  %v1789_v53 = vcombine.low %v1781_v51, %v1788_v52 }
 0x88d   :  { %v1651_v5 = vrot.slane %v1637_v2, %v3893_v21  ;;  %v1644_v6 = vrot.slane %v1636_v38, %v3893_v21 }
 0x88e   :  { %2258 = vmatprep.mubr.bf16.mxu0 %v2068_v3 }
 0x88f   :  { %2640 = vmatpush3.bf16.msra.mxu0 %v2932_v43  ;;  %1823 = vmatprep.mubr.bf16.mxu1 %v1651_v5 }
 0x890   :  { %1824 = vmatmul.mubr.bf16.vlgmr.msra.gmra.mrb[32].mxu1 %v1644_v6  ;;  %2641 = vmatprep.subr.bf16.mxu0 %v2933_v4 }
 0x891   :  { %2841 = vmatpush3.bf16.msra.mxu1 %v2934_v32  ;;  %2856 = vmatprep.mubr.msk.bf16.mxu1 %vm3072_vm0, %v3070_v1 }
 0x892   :  { %2842 = vmatprep.subr.bf16.mxu1 %v3070_v1 }
 0x893   :  { %2642 = vmatpush3.bf16.msra.mxu0 %v2935_v33 }
 0x894   :  { %2643 = vmatprep.subr.bf16.mxu0 %v2936_v9 }
 0x895   :  { %2843 = vmatpush3.bf16.msra.mxu1 %v2937_v7 }
 0x896   :  { %2844 = vmatprep.subr.bf16.mxu1 %v3070_v1 }
 0x897   :  { %2644 = vmatpush3.bf16.msra.mxu0 %v2938_v12 }
 0x899   :  { %2845 = vmatpush3.bf16.msra.mxu1 %v2939_v8 }
 0x89a   :  { %2259 = vmatmul.mubr.bf16.vlgmr.msra.gmra.mrb[36].mxu0 %v2061_v15  ;;  %2846 = vmatprep.subr.bf16.mxu1 %v3070_v1 }
 0x89d   :  { %2847 = vmatpush3.bf16.msra.mxu1 %v2940_v13 }
 0x89e   :  { %2848 = vmatprep.subr.bf16.mxu1 %v3070_v1 }
 0x8a1   :  { %2849 = vmatpush3.bf16.msra.mxu1 %v2941_v14 }
 0x8a2   :  { %2850 = vmatprep.subr.bf16.mxu1 %v3070_v1 }
 0x8a5   :  { %2851 = vmatpush3.bf16.msra.mxu1 %v2942_v16 }
 0x8a6   :  { %2852 = vmatprep.subr.bf16.mxu1 %v3070_v1 }
 0x8a9   :  { %2853 = vmatpush3.bf16.msra.mxu1 %v2943_v17 }
 0x8aa   :  { %2854 = vmatprep.subr.bf16.mxu1 %v3070_v1 }
 0x8ad   :  { %2855 = vmatpush3.bf16.msra.mxu1 %v2944_v28 }
 0x8b0   :  { %2857 = vmatmul.mubr.bf16.vlgmr.msra.gmra.mrb[36].mxu1 %v2069_v30 }
 0x94d   :  { %v1465_v24 = vpop.f32.mrb[32].mxu0 }
 0x94e   :  { %v2838_v25 = vpop.f32.mrb[33].mxu0  ;;  %v1466_v48 = vadd.f32 %v1465_v24, %v1429_v44 }
 0x94f   :  { %v1468_v1 = vpop.f32.mrb[34].mxu0 }
 0x950   :  { %v2839_v59 = vpop.f32.mrb[35].mxu0  ;;  %v1472_v35 = vcombine.high %v1466_v48, %v1466_v48  ;;  %v1474_v47 = vmax.f32 %v1466_v48, 0.0 }
 0x952   :  { %v1475_v55 = vmax.f32 %v1472_v35, 0.0  ;;  %v1477_v63 = vsel %vm1476_vm1, %v1474_v47, -inf  ;;  %v2224_v35 = vrot.slane %v2217_v42, %v3355_v37 }
 0x953   :  { %v1478_v5 = vrot.slane %v1477_v63, 4 }
 0x954   :  { %v1484_v62 = vsel %vm1476_vm1, %v1475_v55, -inf }
 0x955   :  { %v1485_v27 = vrot.slane %v1484_v62, 4  ;;  %v1479_v18 = vmax.f32 %v1477_v63, %v1478_v5 }
 0x957   :  { %v1486_v15 = vmax.f32 %v1484_v62, %v1485_v27  ;;  %v1480_v10 = vrot.slane %v1479_v18, 2 }
 0x959   :  { %v1487_v23 = vrot.slane %v1486_v15, 2  ;;  %v1481_v41 = vmax.f32 %v1479_v18, %v1480_v10 }
 0x95b   :  { %v1488_v39 = vmax.f32 %v1486_v15, %v1487_v23  ;;  %v1482_v52 = vrot.slane %v1481_v41, 1 }
 0x95d   :  { %v1489_v46 = vrot.slane %v1488_v39, 1  ;;  %v1483_v47 = vmax.f32 %v1481_v41, %v1482_v52 }
 0x95f   :  { %v1490_v55 = vmax.f32 %v1488_v39, %v1489_v46 }
 0x961   :  { %v2337_v27 = vsel %vm2336_vm3, %v1490_v55, %v1483_v47 }
 0x963   :  { %v2623_v36 = vpop.f32.mrb[32].mxu1 }
 0x964   :  { %v2624_v54 = vpop.f32.mrb[33].mxu1 }
 0x965   :  { %v2625_v56 = vadd.f32 %v2624_v54, %v2623_v36  ;;  %v2626_v57 = vpop.f32.mrb[34].mxu1  ;;  %v2351_v54 = vsub.s32 0, %v3348_v29 }
 0x966   :  { %v2627_v58 = vpop.f32.mrb[35].mxu1 }
 0x967   :  { %v1826_v61 = vadd.f32 %v2625_v56, %v1789_v53  ;;  %v2355_v58 = vsub.s32 1, %v3348_v29 }
 0x969   :  { %v1832_v49 = vcombine.high %v1826_v61, %v1826_v61  ;;  %v1839_v50 = vrot.slane %v1826_v61, %v3893_v21 }
 0x96b   :  { %v1846_v31 = vrot.slane %v1832_v49, %v3893_v21  ;;  %v1847_v34 = vcombine.high %v1839_v50, %v1839_v50  ;;  %v1855_v26 = vrot.slane %v1839_v50, %v3893_v21 }
 0x96d   :  { %v1848_v43 = vcombine.high %v1846_v31, %v1846_v31  ;;  %v1862_v2 = vrot.slane %v1846_v31, %v3893_v21  ;;  %v1869_v38 = vrot.slane %v1847_v34, %v3893_v21  ;;  %v1877_v3 = vcombine.high %v1855_v26, %v1855_v26  ;;  %v2645_v4 = vpop.f32.mrb[36].mxu0 }
 0x96e   :  { %v1885_v6 = vmax.f32 %v1855_v26, 0.0  ;;  %v2646_v32 = vpop.f32.mrb[37].mxu0 }
 0x96f   :  { %v1876_v33 = vrot.slane %v1848_v43, %v3893_v21  ;;  %v1878_v9 = vcombine.high %v1869_v38, %v1869_v38  ;;  %v1886_v7 = vmax.f32 %v1869_v38, 0.0  ;;  %v1887_v12 = vmax.f32 %v1877_v3, 0.0  ;;  %v2648_v8 = vpop.f32.mrb[38].mxu0 }
 0x970   :  { %v2647_v13 = vadd.f32 %v2646_v32, %v2645_v4  ;;  %v2649_v14 = vpop.f32.mrb[39].mxu0  ;;  %v1889_v17 = vmax.f32 %v1862_v2, 0.0 }
 0x971   :  { %v1888_v16 = vmax.f32 %v1878_v9, 0.0  ;;  %v1890_v28 = vmax.f32 %v1876_v33, 0.0  ;;  %v1897_v30 = vcombine.low %v1885_v6, %v1886_v7  ;;  %v1911_v20 = vrot.slane %v1887_v12, %v3893_v21 }
 0x972   :  { %v2261_v61 = vadd.f32 %v2647_v13, %v2224_v35 }
 0x973   :  { %v1904_v19 = vrot.slane %v1897_v30, %v3893_v21  ;;  %v1920_v22 = vcombine.low %v1888_v16, %v1889_v17  ;;  %v1934_v1 = vrot.slane %v1890_v28, %v3893_v21 }
 0x975   :  { %v1912_v24 = vcombine.low %v1904_v19, %v1911_v20  ;;  %v1927_v25 = vrot.slane %v1920_v22, %v3893_v21  ;;  %v2359_v22 = vsub.s32 2, %v3348_v29 }
 0x977   :  { %v1919_v11 = vrot.slane %v1912_v24, %v3893_v21  ;;  %v1935_v59 = vcombine.low %v1927_v25, %v1934_v1 }
 0x979   :  { %v1942_v0 = vrot.slane %v1935_v59, %v3893_v21  ;;  %v1946_v40 = vsel %vm1945_vm2, %v1919_v11, -inf  ;;  %v2347_v21 = vld [vmem:[%s4045_s9] sm:$0x7] }
 0x97a   :  { %v1947_v44 = vrot.slane %v1946_v40, 4  ;;  %v2352_v63 = vrot.slane %v2347_v21, %v2351_v54  ;;  %v2356_v2 = vrot.slane %v2347_v21, %v2355_v58  ;;  %v2360_v1 = vrot.slane %v2347_v21, %v2359_v22 }
 0x97b   :  { %v1953_v45 = vsel %vm1945_vm2, %v1942_v0, -inf }
 0x97c   :  { %v1948_v48 = vmax.f32 %v1946_v40, %v1947_v44  ;;  %v1954_v51 = vrot.slane %v1953_v45, 4  ;;  %v2364_v6 = vmul.f32 %v2352_v63, %v2337_v27  ;;  %v2524_v40 = vld [vmem:[#allocation2] ss:$0 sm:$0xff] }
 0x97e   :  { %v1949_v36 = vrot.slane %v1948_v48, 2  ;;  %v1955_v53 = vmax.f32 %v1953_v45, %v1954_v51  ;;  %v2367_v13 = vsel %vm2319_vm4, %v2364_v6, 0.0 }
 0x980   :  { %v1950_v56 = vmax.f32 %v1948_v48, %v1949_v36  ;;  %v1956_v57 = vrot.slane %v1955_v53, 2 }
 0x982   :  { %v1951_v62 = vrot.slane %v1950_v56, 1  ;;  %v1957_v49 = vmax.f32 %v1955_v53, %v1956_v57 }
 0x983   :  { %v2300_v50 = vpop.f32.mrb[36].mxu1 }
 0x984   :  { %v2301_v31 = vadd.f32 %v2300_v50, %v2261_v61  ;;  %v2858_v34 = vpop.f32.mrb[37].mxu1  ;;  %v1958_v26 = vrot.slane %v1957_v49, 1  ;;  %v1952_v4 = vmax.f32 %v1950_v56, %v1951_v62 }
 0x985   :  { %v2303_v43 = vpop.f32.mrb[38].mxu1 }
 0x986   :  { %v2313_v38 = vrot.slane %v2301_v31, %v3355_v37  ;;  %v2859_v3 = vpop.f32.mrb[39].mxu1  ;;  %v1959_v5 = vmax.f32 %v1957_v49, %v1958_v26 }
 0x988   :  { %v2314_v32 = vcombine.high %v2313_v38, %v2313_v38  ;;  %v2317_v33 = vmax.f32 %v2313_v38, 0.0  ;;  %v2341_v9 = vsel %vm2336_vm3, %v1959_v5, %v1952_v4 }
 0x989   :  { %v2365_v7 = vmul.f32 %v2356_v2, %v2341_v9 }
 0x98a   :  { %v2318_v12 = vmax.f32 %v2314_v32, 0.0  ;;  %v2320_v8 = vsel %vm2319_vm4, %v2317_v33, -inf }
 0x98b   :  { %v2321_v15 = vrot.slane %v2320_v8, 4  ;;  %v2368_v14 = vsel %vm2319_vm4, %v2365_v7, 0.0 }
 0x98c   :  { %v2327_v37 = vsel %vm2319_vm4, %v2318_v12, -inf  ;;  %v2369_v16 = vadd.f32 %v2368_v14, %v2367_v13 }
 0x98d   :  { %v2322_v17 = vmax.f32 %v2320_v8, %v2321_v15  ;;  %v2328_v28 = vrot.slane %v2327_v37, 4 }
 0x98f   :  { %v2323_v30 = vrot.slane %v2322_v17, 2  ;;  %v2329_v18 = vmax.f32 %v2327_v37, %v2328_v28 }
 0x991   :  { %v2324_v19 = vmax.f32 %v2322_v17, %v2323_v30  ;;  %v2330_v20 = vrot.slane %v2329_v18, 2 }
 0x993   :  { %v2331_v23 = vmax.f32 %v2329_v18, %v2330_v20  ;;  %v2325_v24 = vrot.slane %v2324_v19, 1 }
 0x995   :  { %v2332_v25 = vrot.slane %v2331_v23, 1  ;;  %v2326_v10 = vmax.f32 %v2324_v19, %v2325_v24 }
 0x997   :  { %v2333_v11 = vmax.f32 %v2331_v23, %v2332_v25 }
 0x999   :  { %v2345_v59 = vsel %vm2336_vm3, %v2333_v11, %v2326_v10 }
 0x99a   :  { %v2366_v60 = vmul.f32 %v2360_v1, %v2345_v59 }
 0x99c   :  { %v2370_v39 = vsel %vm2319_vm4, %v2366_v60, 0.0 }
 0x99d   :  { %v2371_v0 = vadd.f32 %v2370_v39, %v2369_v16 }
 0x99f   :  { %2372 = vadd.xlane.f32.xlu0 %v2371_v0 }
 0xa2c   :  { %v2373_v41 = vpop.xlane.xlu0 %2372 }
 0xa2d   :  { %v2381_v42 = vadd.f32 %v2524_v40, %v2373_v41 }
 0xa2f   :  { %v2525_v44 = vmul.f32 -1.442695, %v2381_v42 }
 0xa31   :  { %3041 = vpow2.f32 %v2525_v44 }
 0xa3b   :  { %v3042_v45 = vpop.eup %3041 }
 0xa3c   :  { %v2385_v29 = vadd.f32 1.0, %v3042_v45 }
 0xa3e   :  { %3043 = vrcp.f32 %v2385_v29 }
 0xa48   :  { %v3044_v46 = vpop.eup %3043 }
 0xa49   :  { %2389 = vst.msk [vmem:[%s4046_s11] sm:$0x3] %vm2388_vm5, %v3044_v46 }

</bundles_post_ra>
